<compile_context>
chip_gen: v5e
topology: v5e:2x2
jax: 0.10.0
libtpu: 0.0.40
codegen_flags: <defaults>
</compile_context>

<pallas_src>
import functools

import jax
import jax.numpy as jnp
from jax.experimental import pallas as pl
from jax.experimental.pallas import tpu as pltpu

NEG_SLOPE = 0.1   # LeakyReLU negative slope (constructor arg of the module)
GIN_EPS = 0.0     # DenseGINConv eps (train_eps=False default)
BN_EPS = 1e-5


def _leaky(x, neg):
    return jnp.where(x >= 0, x, neg * x)


# ----------------------------------------------------------------------------
# Fused kernel: all GIN layers + node pooling for one (Bb graphs x R runs) block
# ----------------------------------------------------------------------------
def gin_fused_kernel(adj_ref, m_ref, keep_ref, x_ref,
                     w1_ref, b1_ref, w2_ref, b2_ref, o_ref,
                     *, R, Bb, N, H, L, neg, eps, mxu_dtype):
    dt = mxu_dtype
    Gb = Bb * R              # graph instances this step (batch-major, run-minor)
    M = Gb * N               # flattened MLP rows

    # Run-replicated dropped features built in VMEM (x is NOT R-fold in HBM).
    x = x_ref[...]                                        # [Bb, N, H]
    keep = keep_ref[...]                                  # [Bb, R, N]
    h0 = x[:, None, :, :] * keep[:, :, :, None]           # [Bb, R, N, H]
    o_ref[0] = jnp.sum(h0, axis=2)                        # layer-0 node pooling
    h = h0.reshape(Gb, N, H)

    # Run-replicated adjacency in VMEM (leading-dim broadcast+reshape only;
    # no [M, M] block-diagonal temporary, no iota/mod masking work).
    adj = adj_ref[...]                                    # [Bb, N, N]
    adj_g = jnp.broadcast_to(adj[:, None], (Bb, R, N, N)).reshape(Gb, N, N).astype(dt)

    # Node-row mask hoisted ONCE at full [M, H] (JAX does not CSE broadcasts).
    m = m_ref[...]                                        # [Bb, N, 1]
    mask_mh = jnp.broadcast_to(m[:, None, :, :], (Bb, R, N, H)).reshape(M, H)

    # All layers fused: activations never round-trip HBM between layers.
    # TODO(synk): switch to lax.fori_loop with dynamic w1_ref[l]/o_ref[l+1] indexing
    # if num_layers grows large (vreg pressure of full unrolling).
    for l in range(L):
        # GIN aggregation as a per-graph batched matmul: [Gb,N,N] @ [Gb,N,H].
        agg = jnp.einsum("gij,gjh->gih", adj_g, h.astype(dt),
                         preferred_element_type=jnp.float32)
        t = (agg + (1.0 + eps) * h).reshape(M, H)         # leading-dim reshape only
        # Conv MLP (inference BatchNorms folded into W/b on the host).
        h1 = jnp.dot(t.astype(dt), w1_ref[l].astype(dt),
                     preferred_element_type=jnp.float32) + b1_ref[l]
        h1 = _leaky(h1, neg)
        h2 = jnp.dot(h1.astype(dt), w2_ref[l].astype(dt),
                     preferred_element_type=jnp.float32) + b2_ref[l]
        h2 = h2 * mask_mh                                 # DenseGINConv padded-node mask
        hf = _leaky(h2, neg)                              # outer F.leaky_relu
        o_ref[l + 1] = jnp.sum(hf.reshape(Bb, R, N, H), axis=2)   # fused node pooling
        h = hf.reshape(Gb, N, H)
    # TODO(synk): for H=32 a transposed [H, M] lane-dense activation layout (review
    # item) would further improve VPU/MXU lane utilization; kept row-major for clarity.


# ----------------------------------------------------------------------------
# VMEM budgeting + generation-aware block sizing
# ----------------------------------------------------------------------------
def _pad_tile_elems(shape):
    """Elements of a block with its last two dims padded to the (8, 128) vreg tile."""
    s = list(shape)
    if len(s) == 1:
        s = [1] + s
    s[-1] = -(-s[-1] // 128) * 128
    s[-2] = -(-s[-2] // 8) * 8
    n = 1
    for d in s:
        n *= d
    return n


def _vmem_step_bytes(Bb, R, N, H, L, itemsize=4):
    """Rough per-grid-step VMEM footprint: double-buffered I/O blocks + weights
    plus a handful of [M, H] / [Gb, N, *] activation temporaries."""
    M = Bb * R * N
    io_blocks = [(Bb, N, N), (Bb, N, 1), (Bb, R, N), (Bb, N, H),
                 (L, H, H), (L, 1, H), (L, H, H), (L, 1, H),
                 (L + 1, Bb, R, H)]
    dbl = 2 * sum(_pad_tile_elems(s) for s in io_blocks) * itemsize
    acts = (8 * _pad_tile_elems((M, H))
            + 2 * _pad_tile_elems((Bb * R, N, N))
            + 2 * _pad_tile_elems((Bb * R, N, H))) * itemsize
    return dbl + acts


def _choose_batch_block(B, R, N, H, L, *, vmem_budget_bytes=24 << 20,
                        m_target=256, min_grid_steps=2):
    """Largest divisor of B such that (a) the grid keeps >= min_grid_steps steps
    (v7x has 2 TensorCores and a 1-step grid also disables DMA pipelining),
    (b) the per-step footprint fits a conservative all-generation VMEM budget,
    (c) the MXU row dim M = Bb*R*N grows toward the target without overshooting."""
    best = 1
    for bb in range(1, B + 1):
        if B % bb:
            continue
        if B >= min_grid_steps and B // bb < min_grid_steps:
            continue
        if _vmem_step_bytes(bb, R, N, H, L) > vmem_budget_bytes:
            continue
        if bb * R * N <= max(m_target, R * N):
            best = bb
    return best


# ----------------------------------------------------------------------------
# pallas_call wrapper
# ----------------------------------------------------------------------------
def gin_fused(adj, mask3, keep, x, w1s, b1s, w2s, b2s, *, batch_block,
              neg=NEG_SLOPE, eps=GIN_EPS, mxu_dtype=jnp.float32):
    B, N, _ = adj.shape
    _, R, _ = keep.shape
    H = x.shape[-1]
    L = w1s.shape[0]
    Bb = batch_block
    assert B % Bb == 0

    est = _vmem_step_bytes(Bb, R, N, H, L)
    # Floor at 16 MiB (v5e scoped default), cap at 64 MiB (v7x physical VMEM).
    vmem_limit = int(min(64 << 20, max(16 << 20, 2 * est)))

    kernel = functools.partial(gin_fused_kernel, R=R, Bb=Bb, N=N, H=H, L=L,
                               neg=neg, eps=eps, mxu_dtype=mxu_dtype)
    batch_only = lambda i: (i, 0, 0)
    rep3 = lambda i: (0, 0, 0)
    return pl.pallas_call(
        kernel,
        out_shape=jax.ShapeDtypeStruct((L + 1, B, R, H), jnp.float32),
        grid=(B // Bb,),
        in_specs=[
            pl.BlockSpec((Bb, N, N), batch_only),       # adjacency (batch only)
            pl.BlockSpec((Bb, N, 1), batch_only),       # node-validity mask (batch only)
            pl.BlockSpec((Bb, R, N), batch_only),       # DropGIN keep mask (no feature rep)
            pl.BlockSpec((Bb, N, H), batch_only),       # node features (no run replication)
            pl.BlockSpec((L, H, H), rep3),              # folded W1 (all layers)
            pl.BlockSpec((L, 1, H), rep3),              # folded b1
            pl.BlockSpec((L, H, H), rep3),              # folded W2
            pl.BlockSpec((L, 1, H), rep3),              # folded b2
        ],
        out_specs=pl.BlockSpec((L + 1, Bb, R, H), lambda i: (0, i, 0, 0)),
        compiler_params=pltpu.CompilerParams(
            dimension_semantics=("parallel",),          # batch-block axis shards across TCs
            vmem_limit_bytes=vmem_limit),
    )(adj, mask3, keep, x, w1s, b1s, w2s, b2s)


# ----------------------------------------------------------------------------
# Full forward (glue in plain JAX)
# ----------------------------------------------------------------------------
def dense_drop_gin_forward(x, adj, mask, drop, params, *, num_layers, num_runs,
                           pool_type="mean", mxu_dtype=jnp.float32):
    B, N, F = x.shape
    R = num_runs
    L = num_layers
    H = params["convs"][0]["w1"].shape[1]
    # The module's readout stacks layer-0 features with hidden outputs via .view(),
    # which requires num_features == hidden_units.
    assert F == H, "DenseDropGIN readout requires num_features == hidden_units"

    mask_f = mask.astype(jnp.float32)

    # DropGIN keep mask [B, R, N]; the run-replicated dropped features are formed
    # inside the kernel in VMEM (no [B, R, N, H] tensor in HBM).
    keep = jnp.transpose(1.0 - drop.astype(jnp.float32), (1, 0, 2))

    # Fold the (inference-mode) BatchNorm affines into the Linear weights.
    cv = params["convs"]
    w1s = jnp.stack([p["w1"] * p["s1"] for p in cv]).astype(mxu_dtype)       # [L, H, H]
    b1s = jnp.stack([p["b1"] * p["s1"] + p["t1"] for p in cv])               # [L, 1, H]
    w2s = jnp.stack([p["w2"] * p["s_out"] for p in cv]).astype(mxu_dtype)    # [L, H, H]
    b2s = jnp.stack([p["b2"] * p["s_out"] + p["t_out"] for p in cv])         # [L, 1, H]

    Bb = _choose_batch_block(B, R, N, H, L)
    pooled = gin_fused(adj, mask_f[..., None], keep, x, w1s, b1s, w2s, b2s,
                       batch_block=Bb, mxu_dtype=mxu_dtype)                  # [L+1, B, R, H]

    # Readout: trivially small, leave it to XLA (per performance review).
    pooled = jnp.mean(pooled, axis=2)                                        # mean over runs
    if pool_type == "mean":
        num_nodes = jnp.sum(mask_f, axis=-1)                                 # [B]
        pooled = pooled / num_nodes[None, :, None]
    # TODO(synk): F.dropout on the logits is a no-op in inference mode (training=False).
    logits = jnp.einsum("lbh,lho->bo", pooled, params["fc_w"])
    return logits + jnp.sum(params["fc_b"][:, 0, :], axis=0)


# ----------------------------------------------------------------------------
# Pure-JAX reference (same math, no Pallas, no folding) for correctness checking
# ----------------------------------------------------------------------------
def reference_forward(x, adj, mask, drop, params, *, num_layers, num_runs,
                      pool_type="mean"):
    B, N, F = x.shape
    R = num_runs
    mask_f = mask.astype(jnp.float32)
    xr = jnp.broadcast_to(x[None], (R, B, N, F)) * \
        (1.0 - drop.astype(jnp.float32))[..., None]
    outs = [xr]
    h = xr
    for i in range(num_layers):
        p = params["convs"][i]
        agg = jnp.einsum("bij,rbjd->rbid", adj, h)
        t = agg + (1.0 + GIN_EPS) * h
        h1 = t @ p["w1"] + p["b1"][0]
        h1 = _leaky(h1 * p["s1"][0] + p["t1"][0], NEG_SLOPE)
        h2 = h1 @ p["w2"] + p["b2"][0]
        h2 = h2 * mask_f[None, :, :, None]
        mb = mask[None, :, :, None]
        h2 = jnp.where(mb, h2 * p["s_out"][0] + p["t_out"][0], h2)
        h = _leaky(h2, NEG_SLOPE)
        outs.append(h)
    num_nodes = jnp.sum(mask_f, axis=-1, keepdims=True)
    out = 0.0
    for i, xo in enumerate(outs):
        pooled = xo.mean(0).sum(1)
        if pool_type == "mean":
            pooled = pooled / num_nodes
        out = out + pooled @ params["fc_w"][i] + params["fc_b"][i, 0]
    return out


# ----------------------------------------------------------------------------
# Deterministic parameter init (matches nn.Module __init__ shapes; BN in eval)
# ----------------------------------------------------------------------------
def init_params(key, num_features, hidden, num_outputs, num_layers):
    keys = iter(jax.random.split(key, 128))

    def lin(din, dout):
        w = jax.random.normal(next(keys), (din, dout), jnp.float32) / jnp.sqrt(din)
        b = 0.01 * jax.random.normal(next(keys), (1, dout), jnp.float32)
        return w, b

    def bn(d):
        gamma = 1.0 + 0.1 * jax.random.normal(next(keys), (1, d), jnp.float32)
        beta = 0.05 * jax.random.normal(next(keys), (1, d), jnp.float32)
        mean = 0.01 * jax.random.normal(next(keys), (1, d), jnp.float32)
        var = 1.0 + 0.1 * jnp.abs(jax.random.normal(next(keys), (1, d), jnp.float32))
        s = gamma / jnp.sqrt(var + BN_EPS)
        t = beta - mean * s
        return s, t

    convs = []
    din = num_features
    for _ in range(num_layers):
        w1, b1 = lin(din, hidden)
        s1, t1 = bn(hidden)                 # BN inside the conv MLP
        w2, b2 = lin(hidden, hidden)
        s_out, t_out = bn(hidden)           # outer self.bns[i]
        convs.append(dict(w1=w1, b1=b1, s1=s1, t1=t1, w2=w2, b2=b2,
                          s_out=s_out, t_out=t_out))
        din = hidden

    fcw, fcb = [], []
    for d in [num_features] + [hidden] * num_layers:   # fcs[0..num_layers]
        w, b = lin(d, num_outputs)
        fcw.append(w)
        fcb.append(b.reshape(1, 1, num_outputs))
    return dict(convs=convs, fc_w=jnp.stack(fcw), fc_b=jnp.concatenate(fcb, 0))


if __name__ == "__main__":
    B, N, F, H, O = 4, 16, 32, 32, 4     # F == H required by the module's .view()
    R, L, P_DROP = 3, 2, 0.2             # B=4 -> grid=(2,): pipelined, both v7x TCs busy

    key = jax.random.PRNGKey(0)
    k1, k2, k3, k4 = jax.random.split(key, 4)

    # node mask: varying real-node counts per graph
    n_nodes = jnp.array([12, 16, 9, 14])
    mask = jnp.arange(N)[None, :] < n_nodes[:, None]          # [B, N] bool

    # node features, zero on padded nodes (to_dense_data semantics)
    x = jax.random.normal(k1, (B, N, F), jnp.float32) * mask[..., None]

    # random symmetric adjacency restricted to real nodes
    a = (jax.random.uniform(k2, (B, N, N)) < 0.3).astype(jnp.float32)
    a = jnp.maximum(a, jnp.swapaxes(a, 1, 2))
    a = a * (1.0 - jnp.eye(N))[None]
    a = a * mask[:, :, None] * mask[:, None, :]

    # DropGIN node-drop mask (torch.bernoulli(p) on real nodes), deterministic
    drop = jax.random.bernoulli(k3, P_DROP, (R, B, N)) & mask[None]

    params = init_params(k4, F, H, O, L)

    out = dense_drop_gin_forward(x, a, mask, drop, params,
                                 num_layers=L, num_runs=R, pool_type="mean")
    out = jax.block_until_ready(out)

    ref = reference_forward(x, a, mask, drop, params,
                            num_layers=L, num_runs=R, pool_type="mean")
    assert out.shape == (B, O)
    assert jnp.allclose(out, ref, atol=1e-3, rtol=1e-3), (out, ref)
    print("KERNEL_OK")
</pallas_src>

<mosaic_0001>
module attributes {stable_mosaic.version = 11 : i64} {
  func.func @gin_fused_kernel(%arg0: i32, %arg1: memref<2x16x16xf32, #tpu.memory_space<vmem>>, %arg2: memref<2x16x1xf32, #tpu.memory_space<vmem>>, %arg3: memref<2x3x16xf32, #tpu.memory_space<vmem>>, %arg4: memref<2x16x32xf32, #tpu.memory_space<vmem>>, %arg5: memref<2x32x32xf32, #tpu.memory_space<vmem>>, %arg6: memref<2x1x32xf32, #tpu.memory_space<vmem>>, %arg7: memref<2x32x32xf32, #tpu.memory_space<vmem>>, %arg8: memref<2x1x32xf32, #tpu.memory_space<vmem>>, %arg9: memref<3x2x3x32xf32, #tpu.memory_space<vmem>>) attributes {dimension_semantics = [#tpu.dimension_semantics<parallel>], iteration_bounds = array<i64: 2>, scalar_prefetch = 0 : i64, scratch_operands = 0 : i64, tpu.core_type = #tpu.core_type<tc>, window_params = [{transform_indices = @transform_0, window_bounds = array<i64: 2, 16, 16>}, {transform_indices = @transform_1, window_bounds = array<i64: 2, 16, 1>}, {transform_indices = @transform_2, window_bounds = array<i64: 2, 3, 16>}, {transform_indices = @transform_3, window_bounds = array<i64: 2, 16, 32>}, {pipeline_mode = #tpu.pipeline_mode<synchronous>, transform_indices = @transform_4, window_bounds = array<i64: 2, 32, 32>}, {pipeline_mode = #tpu.pipeline_mode<synchronous>, transform_indices = @transform_5, window_bounds = array<i64: 2, 1, 32>}, {pipeline_mode = #tpu.pipeline_mode<synchronous>, transform_indices = @transform_6, window_bounds = array<i64: 2, 32, 32>}, {pipeline_mode = #tpu.pipeline_mode<synchronous>, transform_indices = @transform_7, window_bounds = array<i64: 2, 1, 32>}, {transform_indices = @transform_8, window_bounds = array<i64: 3, 2, 3, 32>}]} {
    %c0 = arith.constant 0 : index
    %c0_0 = arith.constant 0 : index
    %c0_1 = arith.constant 0 : index
    %0 = vector.load %arg4[%c0, %c0_0, %c0_1] : memref<2x16x32xf32, #tpu.memory_space<vmem>>, vector<2x16x32xf32>
    %c0_2 = arith.constant 0 : index
    %c0_3 = arith.constant 0 : index
    %c0_4 = arith.constant 0 : index
    %1 = vector.load %arg3[%c0_2, %c0_3, %c0_4] : memref<2x3x16xf32, #tpu.memory_space<vmem>>, vector<2x3x16xf32>
    %2 = vector.shape_cast %0 : vector<2x16x32xf32> to vector<2x1x16x32xf32>
    %3 = vector.shape_cast %1 : vector<2x3x16xf32> to vector<2x3x16x1xf32>
    %4 = vector.broadcast %2 : vector<2x1x16x32xf32> to vector<2x3x16x32xf32>
    %5 = vector.broadcast %3 : vector<2x3x16x1xf32> to vector<2x3x16x32xf32>
    %6 = arith.mulf %4, %5 : vector<2x3x16x32xf32>
    %cst = arith.constant dense<0.000000e+00> : vector<2x3x32xf32>
    %7 = vector.multi_reduction <add>, %6, %cst [2] : vector<2x3x16x32xf32> to vector<2x3x32xf32>
    %c0_5 = arith.constant 0 : index
    %c0_6 = arith.constant 0 : index
    %c0_7 = arith.constant 0 : index
    %c0_8 = arith.constant 0 : index
    %8 = vector.load %arg9[%c0_5, %c0_6, %c0_7, %c0_8] : memref<3x2x3x32xf32, #tpu.memory_space<vmem>>, vector<1x2x3x32xf32>
    %9 = vector.shape_cast %8 : vector<1x2x3x32xf32> to vector<2x3x32xf32>
    %10 = vector.shape_cast %7 : vector<2x3x32xf32> to vector<1x2x3x32xf32>
    tpu.vector_store %arg9[%c0_5, %c0_6, %c0_7, %c0_8], %10 {strides = array<i32>} : memref<3x2x3x32xf32, #tpu.memory_space<vmem>>, vector<1x2x3x32xf32>,
    %11 = vector.shape_cast %6 : vector<2x3x16x32xf32> to vector<6x16x32xf32>
    %c0_9 = arith.constant 0 : index
    %c0_10 = arith.constant 0 : index
    %c0_11 = arith.constant 0 : index
    %12 = vector.load %arg1[%c0_9, %c0_10, %c0_11] : memref<2x16x16xf32, #tpu.memory_space<vmem>>, vector<2x16x16xf32>
    %13 = vector.shape_cast %12 : vector<2x16x16xf32> to vector<2x1x16x16xf32>
    %14 = vector.shape_cast %13 : vector<2x1x16x16xf32> to vector<2x1x16x16xf32>
    %15 = vector.broadcast %14 : vector<2x1x16x16xf32> to vector<2x3x16x16xf32>
    %16 = vector.shape_cast %15 : vector<2x3x16x16xf32> to vector<6x16x16xf32>
    %c0_12 = arith.constant 0 : index
    %c0_13 = arith.constant 0 : index
    %c0_14 = arith.constant 0 : index
    %17 = vector.load %arg2[%c0_12, %c0_13, %c0_14] : memref<2x16x1xf32, #tpu.memory_space<vmem>>, vector<2x16x1xf32>
    %18 = vector.shape_cast %17 : vector<2x16x1xf32> to vector<2x1x16x1xf32>
    %19 = vector.shape_cast %18 : vector<2x1x16x1xf32> to vector<2x1x16x1xf32>
    %20 = vector.broadcast %19 : vector<2x1x16x1xf32> to vector<2x3x16x32xf32>
    %21 = vector.shape_cast %20 : vector<2x3x16x32xf32> to vector<96x32xf32>
    "tpu.trace_start"() <{level = 10 : i32, message = "gij,gjh->gih"}> : () -> ()
    %cst_15 = arith.constant dense<0.000000e+00> : vector<6x16x32xf32>
    %22 = tpu.matmul %16, %11, %cst_15 {dimension_numbers = #tpu.dot_dimension_numbers<[2], [1], [1], [2], [0, 0, 0, 1, 1, 2], [0], [0]>} : vector<6x16x16xf32>, vector<6x16x32xf32>, vector<6x16x32xf32> -> vector<6x16x32xf32>
    "tpu.trace_stop"() : () -> ()
    %cst_16 = arith.constant 1.000000e+00 : f32
    %23 = vector.broadcast %cst_16 : f32 to vector<6x16x32xf32>
    %24 = arith.mulf %23, %11 : vector<6x16x32xf32>
    %25 = arith.addf %22, %24 : vector<6x16x32xf32>
    %26 = vector.shape_cast %25 : vector<6x16x32xf32> to vector<96x32xf32>
    %c0_17 = arith.constant 0 : index
    %c0_18 = arith.constant 0 : index
    %c0_19 = arith.constant 0 : index
    %27 = vector.load %arg5[%c0_17, %c0_18, %c0_19] : memref<2x32x32xf32, #tpu.memory_space<vmem>>, vector<1x32x32xf32>
    %28 = vector.shape_cast %27 : vector<1x32x32xf32> to vector<32x32xf32>
    %cst_20 = arith.constant dense<0.000000e+00> : vector<96x32xf32>
    %29 = tpu.matmul %26, %28, %cst_20 {dimension_numbers = #tpu.dot_dimension_numbers<[1], [0], [0], [1], [0, 0, 1, 1], [], []>} : vector<96x32xf32>, vector<32x32xf32>, vector<96x32xf32> -> vector<96x32xf32>
    %c0_21 = arith.constant 0 : index
    %c0_22 = arith.constant 0 : index
    %c0_23 = arith.constant 0 : index
    %30 = vector.load %arg6[%c0_21, %c0_22, %c0_23] : memref<2x1x32xf32, #tpu.memory_space<vmem>>, vector<1x1x32xf32>
    %31 = vector.shape_cast %30 : vector<1x1x32xf32> to vector<1x32xf32>
    %32 = vector.broadcast %31 : vector<1x32xf32> to vector<96x32xf32>
    %33 = arith.addf %29, %32 : vector<96x32xf32>
    %cst_24 = arith.constant 0.000000e+00 : f32
    %34 = vector.broadcast %cst_24 : f32 to vector<96x32xf32>
    %35 = arith.cmpf oge, %33, %34 : vector<96x32xf32>
    %cst_25 = arith.constant 1.000000e-01 : f32
    %36 = vector.broadcast %cst_25 : f32 to vector<96x32xf32>
    %37 = arith.mulf %36, %33 : vector<96x32xf32>
    %38 = arith.select %35, %33, %37 : vector<96x32xi1>, vector<96x32xf32>
    %c0_26 = arith.constant 0 : index
    %c0_27 = arith.constant 0 : index
    %c0_28 = arith.constant 0 : index
    %39 = vector.load %arg7[%c0_26, %c0_27, %c0_28] : memref<2x32x32xf32, #tpu.memory_space<vmem>>, vector<1x32x32xf32>
    %40 = vector.shape_cast %39 : vector<1x32x32xf32> to vector<32x32xf32>
    %cst_29 = arith.constant dense<0.000000e+00> : vector<96x32xf32>
    %41 = tpu.matmul %38, %40, %cst_29 {dimension_numbers = #tpu.dot_dimension_numbers<[1], [0], [0], [1], [0, 0, 1, 1], [], []>} : vector<96x32xf32>, vector<32x32xf32>, vector<96x32xf32> -> vector<96x32xf32>
    %c0_30 = arith.constant 0 : index
    %c0_31 = arith.constant 0 : index
    %c0_32 = arith.constant 0 : index
    %42 = vector.load %arg8[%c0_30, %c0_31, %c0_32] : memref<2x1x32xf32, #tpu.memory_space<vmem>>, vector<1x1x32xf32>
    %43 = vector.shape_cast %42 : vector<1x1x32xf32> to vector<1x32xf32>
    %44 = vector.broadcast %43 : vector<1x32xf32> to vector<96x32xf32>
    %45 = arith.addf %41, %44 : vector<96x32xf32>
    %46 = arith.mulf %45, %21 : vector<96x32xf32>
    %cst_33 = arith.constant 0.000000e+00 : f32
    %47 = vector.broadcast %cst_33 : f32 to vector<96x32xf32>
    %48 = arith.cmpf oge, %46, %47 : vector<96x32xf32>
    %cst_34 = arith.constant 1.000000e-01 : f32
    %49 = vector.broadcast %cst_34 : f32 to vector<96x32xf32>
    %50 = arith.mulf %49, %46 : vector<96x32xf32>
    %51 = arith.select %48, %46, %50 : vector<96x32xi1>, vector<96x32xf32>
    %52 = vector.shape_cast %51 : vector<96x32xf32> to vector<2x3x16x32xf32>
    %cst_35 = arith.constant dense<0.000000e+00> : vector<2x3x32xf32>
    %53 = vector.multi_reduction <add>, %52, %cst_35 [2] : vector<2x3x16x32xf32> to vector<2x3x32xf32>
    %c1 = arith.constant 1 : index
    %c0_36 = arith.constant 0 : index
    %c0_37 = arith.constant 0 : index
    %c0_38 = arith.constant 0 : index
    %54 = vector.load %arg9[%c1, %c0_36, %c0_37, %c0_38] : memref<3x2x3x32xf32, #tpu.memory_space<vmem>>, vector<1x2x3x32xf32>
    %55 = vector.shape_cast %54 : vector<1x2x3x32xf32> to vector<2x3x32xf32>
    %56 = vector.shape_cast %53 : vector<2x3x32xf32> to vector<1x2x3x32xf32>
    tpu.vector_store %arg9[%c1, %c0_36, %c0_37, %c0_38], %56 {strides = array<i32>} : memref<3x2x3x32xf32, #tpu.memory_space<vmem>>, vector<1x2x3x32xf32>,
    %57 = vector.shape_cast %51 : vector<96x32xf32> to vector<6x16x32xf32>
    "tpu.trace_start"() <{level = 10 : i32, message = "gij,gjh->gih"}> : () -> ()
    %cst_39 = arith.constant dense<0.000000e+00> : vector<6x16x32xf32>
    %58 = tpu.matmul %16, %57, %cst_39 {dimension_numbers = #tpu.dot_dimension_numbers<[2], [1], [1], [2], [0, 0, 0, 1, 1, 2], [0], [0]>} : vector<6x16x16xf32>, vector<6x16x32xf32>, vector<6x16x32xf32> -> vector<6x16x32xf32>
    "tpu.trace_stop"() : () -> ()
    %cst_40 = arith.constant 1.000000e+00 : f32
    %59 = vector.broadcast %cst_40 : f32 to vector<6x16x32xf32>
    %60 = arith.mulf %59, %57 : vector<6x16x32xf32>
    %61 = arith.addf %58, %60 : vector<6x16x32xf32>
    %62 = vector.shape_cast %61 : vector<6x16x32xf32> to vector<96x32xf32>
    %c1_41 = arith.constant 1 : index
    %c0_42 = arith.constant 0 : index
    %c0_43 = arith.constant 0 : index
    %63 = vector.load %arg5[%c1_41, %c0_42, %c0_43] : memref<2x32x32xf32, #tpu.memory_space<vmem>>, vector<1x32x32xf32>
    %64 = vector.shape_cast %63 : vector<1x32x32xf32> to vector<32x32xf32>
    %cst_44 = arith.constant dense<0.000000e+00> : vector<96x32xf32>
    %65 = tpu.matmul %62, %64, %cst_44 {dimension_numbers = #tpu.dot_dimension_numbers<[1], [0], [0], [1], [0, 0, 1, 1], [], []>} : vector<96x32xf32>, vector<32x32xf32>, vector<96x32xf32> -> vector<96x32xf32>
    %c1_45 = arith.constant 1 : index
    %c0_46 = arith.constant 0 : index
    %c0_47 = arith.constant 0 : index
    %66 = vector.load %arg6[%c1_45, %c0_46, %c0_47] : memref<2x1x32xf32, #tpu.memory_space<vmem>>, vector<1x1x32xf32>
    %67 = vector.shape_cast %66 : vector<1x1x32xf32> to vector<1x32xf32>
    %68 = vector.broadcast %67 : vector<1x32xf32> to vector<96x32xf32>
    %69 = arith.addf %65, %68 : vector<96x32xf32>
    %cst_48 = arith.constant 0.000000e+00 : f32
    %70 = vector.broadcast %cst_48 : f32 to vector<96x32xf32>
    %71 = arith.cmpf oge, %69, %70 : vector<96x32xf32>
    %cst_49 = arith.constant 1.000000e-01 : f32
    %72 = vector.broadcast %cst_49 : f32 to vector<96x32xf32>
    %73 = arith.mulf %72, %69 : vector<96x32xf32>
    %74 = arith.select %71, %69, %73 : vector<96x32xi1>, vector<96x32xf32>
    %c1_50 = arith.constant 1 : index
    %c0_51 = arith.constant 0 : index
    %c0_52 = arith.constant 0 : index
    %75 = vector.load %arg7[%c1_50, %c0_51, %c0_52] : memref<2x32x32xf32, #tpu.memory_space<vmem>>, vector<1x32x32xf32>
    %76 = vector.shape_cast %75 : vector<1x32x32xf32> to vector<32x32xf32>
    %cst_53 = arith.constant dense<0.000000e+00> : vector<96x32xf32>
    %77 = tpu.matmul %74, %76, %cst_53 {dimension_numbers = #tpu.dot_dimension_numbers<[1], [0], [0], [1], [0, 0, 1, 1], [], []>} : vector<96x32xf32>, vector<32x32xf32>, vector<96x32xf32> -> vector<96x32xf32>
    %c1_54 = arith.constant 1 : index
    %c0_55 = arith.constant 0 : index
    %c0_56 = arith.constant 0 : index
    %78 = vector.load %arg8[%c1_54, %c0_55, %c0_56] : memref<2x1x32xf32, #tpu.memory_space<vmem>>, vector<1x1x32xf32>
    %79 = vector.shape_cast %78 : vector<1x1x32xf32> to vector<1x32xf32>
    %80 = vector.broadcast %79 : vector<1x32xf32> to vector<96x32xf32>
    %81 = arith.addf %77, %80 : vector<96x32xf32>
    %82 = arith.mulf %81, %21 : vector<96x32xf32>
    %cst_57 = arith.constant 0.000000e+00 : f32
    %83 = vector.broadcast %cst_57 : f32 to vector<96x32xf32>
    %84 = arith.cmpf oge, %82, %83 : vector<96x32xf32>
    %cst_58 = arith.constant 1.000000e-01 : f32
    %85 = vector.broadcast %cst_58 : f32 to vector<96x32xf32>
    %86 = arith.mulf %85, %82 : vector<96x32xf32>
    %87 = arith.select %84, %82, %86 : vector<96x32xi1>, vector<96x32xf32>
    %88 = vector.shape_cast %87 : vector<96x32xf32> to vector<2x3x16x32xf32>
    %cst_59 = arith.constant dense<0.000000e+00> : vector<2x3x32xf32>
    %89 = vector.multi_reduction <add>, %88, %cst_59 [2] : vector<2x3x16x32xf32> to vector<2x3x32xf32>
    %c2 = arith.constant 2 : index
    %c0_60 = arith.constant 0 : index
    %c0_61 = arith.constant 0 : index
    %c0_62 = arith.constant 0 : index
    %90 = vector.load %arg9[%c2, %c0_60, %c0_61, %c0_62] : memref<3x2x3x32xf32, #tpu.memory_space<vmem>>, vector<1x2x3x32xf32>
    %91 = vector.shape_cast %90 : vector<1x2x3x32xf32> to vector<2x3x32xf32>
    %92 = vector.shape_cast %89 : vector<2x3x32xf32> to vector<1x2x3x32xf32>
    tpu.vector_store %arg9[%c2, %c0_60, %c0_61, %c0_62], %92 {strides = array<i32>} : memref<3x2x3x32xf32, #tpu.memory_space<vmem>>, vector<1x2x3x32xf32>,
    return
  }
  func.func @transform_0(%arg0: i32) -> (i32, i32, i32) {
    %c0_i32 = arith.constant 0 : i32
    %c0_i32_0 = arith.constant 0 : i32
    %c0_i32_1 = arith.constant 0 : i32
    return %arg0, %c0_i32, %c0_i32_0 : i32, i32, i32
  }
  func.func @transform_1(%arg0: i32) -> (i32, i32, i32) {
    %c0_i32 = arith.constant 0 : i32
    %c0_i32_0 = arith.constant 0 : i32
    %c0_i32_1 = arith.constant 0 : i32
    return %arg0, %c0_i32, %c0_i32_0 : i32, i32, i32
  }
  func.func @transform_2(%arg0: i32) -> (i32, i32, i32) {
    %c0_i32 = arith.constant 0 : i32
    %c0_i32_0 = arith.constant 0 : i32
    %c0_i32_1 = arith.constant 0 : i32
    return %arg0, %c0_i32, %c0_i32_0 : i32, i32, i32
  }
  func.func @transform_3(%arg0: i32) -> (i32, i32, i32) {
    %c0_i32 = arith.constant 0 : i32
    %c0_i32_0 = arith.constant 0 : i32
    %c0_i32_1 = arith.constant 0 : i32
    return %arg0, %c0_i32, %c0_i32_0 : i32, i32, i32
  }
  func.func @transform_4(%arg0: i32) -> (i32, i32, i32) {
    %c0_i32 = arith.constant 0 : i32
    %c0_i32_0 = arith.constant 0 : i32
    %c0_i32_1 = arith.constant 0 : i32
    %c0_i32_2 = arith.constant 0 : i32
    return %c0_i32, %c0_i32_0, %c0_i32_1 : i32, i32, i32
  }
  func.func @transform_5(%arg0: i32) -> (i32, i32, i32) {
    %c0_i32 = arith.constant 0 : i32
    %c0_i32_0 = arith.constant 0 : i32
    %c0_i32_1 = arith.constant 0 : i32
    %c0_i32_2 = arith.constant 0 : i32
    return %c0_i32, %c0_i32_0, %c0_i32_1 : i32, i32, i32
  }
  func.func @transform_6(%arg0: i32) -> (i32, i32, i32) {
    %c0_i32 = arith.constant 0 : i32
    %c0_i32_0 = arith.constant 0 : i32
    %c0_i32_1 = arith.constant 0 : i32
    %c0_i32_2 = arith.constant 0 : i32
    return %c0_i32, %c0_i32_0, %c0_i32_1 : i32, i32, i32
  }
  func.func @transform_7(%arg0: i32) -> (i32, i32, i32) {
    %c0_i32 = arith.constant 0 : i32
    %c0_i32_0 = arith.constant 0 : i32
    %c0_i32_1 = arith.constant 0 : i32
    %c0_i32_2 = arith.constant 0 : i32
    return %c0_i32, %c0_i32_0, %c0_i32_1 : i32, i32, i32
  }
  func.func @transform_8(%arg0: i32) -> (i32, i32, i32, i32) {
    %c0_i32 = arith.constant 0 : i32
    %c0_i32_0 = arith.constant 0 : i32
    %c0_i32_1 = arith.constant 0 : i32
    %c0_i32_2 = arith.constant 0 : i32
    return %c0_i32, %arg0, %c0_i32_0, %c0_i32_1 : i32, i32, i32, i32
  }
}

</mosaic_0001>

<bundles_post_ra>
// kernel: tpu_custom_call.1
= control target key start
LH: loop header
LB: loop body
LE: loop exit
PB: predicated region body
PF: predicated region fallthrough
CT: control target
= control target key end

     0   :  { %13 = vsyncpa [#allocation3], 0  ;;  %s2731_s0 = inlined_call_operand.vmem [shape: f32[4,16,16], index: 0, kind: input, shape index: {}]   ;;  %s2732_s1 = inlined_call_operand.vmem [shape: f32[4,16,1], index: 1, kind: input, shape index: {}]   ;;  %s2733_s2 = inlined_call_operand.vmem [shape: f32[4,3,16], index: 2, kind: input, shape index: {}]   ;;  %s2734_s3 = inlined_call_operand.hbm [shape: f32[4,16,32], index: 3, kind: input, shape index: {}]   ;;  %s2735_s4 = inlined_call_operand.hbm [shape: f32[2,32,32], index: 4, kind: input, shape index: {}]   ;;  %s2736_s5 = inlined_call_operand.vmem [shape: f32[2,1,32], index: 5, kind: input, shape index: {}]   ;;  %s2737_s6 = inlined_call_operand.hbm [shape: f32[2,32,32], index: 6, kind: input, shape index: {}]   ;;  %s2738_s7 = inlined_call_operand.vmem [shape: f32[2,1,32], index: 7, kind: input, shape index: {}]   ;;  %s2739_s8 = inlined_call_operand.vmem [shape: f32[3,4,3,32], index: 8, kind: output, shape index: {}]  }
   0x1   :  { %15 = vsyncpa [#allocation3 + $0x1], 0 }
   0x2   :  { %16 = vsyncpa [#allocation5], 0  ;;  %s2178_s27 = smov 0   ;;  %s2180_s28 = smov 0  }
   0x3   :  { %s2182_s29 = smov 0   ;;  %s2184_s30 = smov 0  }
   0x4 LB: > { %s2197_s9 = sadd.s32 4294967295, %s2126_s30   ;;  %p120_p0 = scmp.ne.s32.totalorder %s2118_s28, %s2114_s27  ;;  %s2126_s30 = sphi %s2184_s30, %s2750_s30   ;;  %s2122_s29 = sphi %s2182_s29, %s2749_s29   ;;  %s2118_s28 = sphi %s2180_s28, %s2748_s28   ;;  %s2114_s27 = sphi %s2178_s27, %s2747_s27  }
   0x5   : > { %p121_p1 = scmp.eq.s32.totalorder %s2197_s9, 0  ;;  %p228_p2 = scmp.eq.s32.totalorder %s2197_s9, 1 }
   0x6   : > { %p1802_p3 = scmp.ge.s32.totalorder %s2126_s30, 1  ;;  %p241_p4 = scmp.lt.s32.totalorder %s2126_s30, 3 }
   0x7   : > { %p2206_p5 = por %p121_p1, %p120_p0  ;;  %s252_s14 = sshll.u32 %s2735_s4, 4  ;;  %s253_s14 = int_to_ptr.hbm [resolvable:$true] %s252_s14 }
   0x8   : > { %p2210_p6 = pnand %p1802_p3, %p241_p4  ;;  %s2128_s15 = smov [#allocation4]  }
   0x9   : > { %s254_s16 = sshll.u32 %s2128_s15, 4  ;;  %s269_s19 = sshll.u32 %s2737_s6, 4  ;;  %s255_s16 = int_to_ptr.vmem [resolvable:$true] %s254_s16  ;;  %s270_s19 = int_to_ptr.hbm [resolvable:$true] %s269_s19 }
   0xa   : > { %p1928_p7 = pneg %p2210_p6  ;;  %s2740_s20 = smov 128  }
   0xb   : > { %s2130_s21 = smov 8   ;;  %s2131_s22 = smov [#allocation6]  }
   0xc   : > { %p1929_p8 = pnand %p1928_p7, %p121_p1  ;;  %s271_s23 = sshll.u32 %s2131_s22, 4  ;;  %s272_s23 = int_to_ptr.vmem [resolvable:$true] %s271_s23 }
   0xd   : > { %s2228_s24 = sadd.s32 1, %s2126_s30   ;;  %s107_s26 = sadd.s32 1, %s2122_s29 }
   0xe   : > { %1931 = dma.hbm_to_vmem [thread:$0]  (!%p1929_p8), %s253_s14, 1024, %s255_s16, [#allocation5], %s2740_s20, %s2740_s20, %s2130_s21  }
   0xf   : > { %1934 = dma.hbm_to_vmem [thread:$0]  (!%p1929_p8), %s270_s19, 1024, %s272_s23, [#allocation5], %s2740_s20, %s2740_s20, %s2130_s21  }
  0x10   : > { %s104_s25 = ssub.s32 %s2126_s30, %s2228_s24  ;;  %p114_p10 = scmp.ne.s32.totalorder %s2122_s29, %s2118_s28 }
  0x11   : > { %p105_p9 = scmp.eq.s32.totalorder %s104_s25, 0  ;;  %p115_p11 = scmp.eq.s32.totalorder %s2126_s30, 0 }
  0x12   : > { %p2244_p12 = por %p228_p2, %p114_p10  ;;  %p1941_p13 = scmp.lt.s32.totalorder %s2126_s30, 2 }
  0x13   : > { %s2240_s27 = scalar_select %p105_p9, %s2122_s29, %s107_s26  }
  0x14   : > { %s317_s13 = sand.u32 1, %s2122_s29   ;;  %s1905_s14 = sshll.u32 %s2126_s30, 5 }
  0x15   : > { %p116_p0 = por %p115_p11, %p114_p10  ;;  %s1806_s15 = sshll.u32 %s317_s13, 5 }
  0x16   : > { %s327_s18 = scalar_lea.hbm %s2734_s3, %s1905_s14  ;;  %s321_s22 = scalar_lea.vmem [#allocation2], %s1806_s15 }
  0x17   : > { %s328_s19 = sshll.u32 %s327_s18, 4  ;;  %s330_s23 = sshll.u32 %s321_s22, 4  ;;  %s329_s19 = int_to_ptr.hbm [resolvable:$true] %s328_s19  ;;  %s331_s23 = int_to_ptr.vmem [resolvable:$true] %s330_s23 }
  0x18   : > { %p2254_p3 = pnand %p1941_p13, %p116_p0  ;;  %s318_s26 = scalar_lea.sflag [#allocation3], %s317_s13 }
  0x19   : > { %s2058_s20 = sshra.s32 %s329_s19, 4  ;;  %s2065_s15 = scalar_lea.hbm %s2734_s3, 64  ;;  %s2059_s20 = int_to_ptr.hbm [resolvable:$true] %s2058_s20 }
  0x1a   : > { %s2060_s30 = scalar_lea.hbm %s2059_s20, 32  ;;  %p2062_p4 = pneg %p2254_p3 }
  0x1b   : > { %p2061_p2 = scmp.ne.s32.totalorder %s2059_s20, %s2060_s30  ;;  %p2066_p9 = scmp.lt.s32.totalorder %s2059_s20, %s2734_s3 }
  0x1c   : > { %p2067_p10 = scmp.lt.s32.totalorder %s2065_s15, %s2060_s30 }
  0x1d   : > { %p2063_p7 = pnand %p2062_p4, %p2061_p2 }
  0x1e   : > { %p2068_p11 = por %p2067_p10, %p2066_p9 }
  0x1f   : > { %p2064_p8 = pneg %p2063_p7 }
  0x21   : > { %p2069_p13 = pnand %p2068_p11, %p2064_p8 }
  0x23   : > { %2072 = shalt.err (!%p2069_p13)
}
  0x24   : > { %s2745_s13 = smov 128   ;;  %342 = sbr.rel (%p2210_p6) target bundleno = 1125 (0x465), region = 52 }
  0x25   : > { %1938 = dma.hbm_to_vmem [thread:$0]  (!%p2254_p3), %s329_s19, 512, %s331_s23, %s318_s26, %s2745_s13, %s2745_s13, %s2130_s21  }
  0x26   : > { %s2274_s22 = sand.u32 (!%p2210_p6), 1, %s2118_s28  }
  0x27   : > { %s1811_s20 = sshll.u32 (!%p2210_p6), %s2274_s22, 5  ;;  %s345_s30 = scalar_lea.sflag (!%p2210_p6), [#allocation3], %s2274_s22 }
  0x28   : > { %s2278_s14 = scalar_lea.vmem (!%p2210_p6), [#allocation2], %s1811_s20 }
  0x29   : > { %2105 = dma.done.wait (%p2206_p5), %s345_s30, 512  }
  0x2a   : > { %2107 = vsyncadd (%p2206_p5), %s345_s30, 4294966784 }
  0x2b   : > { %2109 = dma.done.wait (%p121_p1), [#allocation5], 2048  }
  0x2c   : > { %2111 = vsyncadd (%p121_p1), [#allocation5], 4294965248  ;;  %v437_v0 = vlaneseq  ;;  %s1814_s11 = sshll.u32 %s2197_s9, 1  ;;  %v431_v11 = vld [vmem:[%s2278_s14 + $0x8] sm:$0xff]  ;;  %v430_v14 = vld [vmem:[%s2278_s14] sm:$0xff]  ;;  %vm626_vm0 = vcmask 130048  }
  0x2d   : > { %p409_p6 = scmp.lt.s32.totalorder %s1814_s11, 3  ;;  %vm526_vm1 = vcmask 261120   ;;  %v433_v42 = vld [vmem:[%s2278_s14 + $0x18] sm:$0xff]  ;;  %s1917_s17 = smul.u32 24, %s2274_s22  ;;  %v432_v54 = vld [vmem:[%s2278_s14 + $0x10] sm:$0xff]  ;;  %vm587_vm2 = vcmask 1041409  }
  0x2e   : > { %v438_v1 = vshrl.u32 %v437_v0, 7  ;;  %vm589_vm3 = vcmask 1042434   ;;  %vm595_vm4 = vcmask 256000   ;;  %s1908_s26 = sshll.u32 (%p2244_p12), %s2197_s9, 3 }
  0x2f   : > { %s2752_s11 = smov (!%p409_p6, %s1814_s11), 3  ;;  %s2372_s18 = scalar_lea.vmem [#allocation7], %s1917_s17 }
  0x30   : > { %v445_v2 = vadd.s32 8, %v438_v1  ;;  %s1821_s21 = sshll.u32 %s2752_s11, 2  ;;  %s1906_s25 = sshll.u32 %s2752_s11, 4 }
  0x31   : > { %s426_s23 = scalar_lea.vmem %s2733_s2, %s1821_s21  ;;  %s2305_s15 = scalar_lea.vmem %s2731_s0, %s1906_s25 }
  0x32   : > { %1985 = vset.pattern.permute.xlu2 %v445_v2  ;;  %1983 = vset.pattern.permute.xlu1 %v445_v2  ;;  %v434_v3 = vld [vmem:[%s426_s23] sm:$0x7]  ;;  %v435_v7 = vld [vmem:[%s426_s23 + $0x4] sm:$0x7]  ;;  %v2317_v20 = vld [vmem:[%s2305_s15 + $0x8] sm:$0xff]  ;;  %s2443_s20 = scalar_lea.vmem %s2732_s1, %s1906_s25  ;;  %s1622_s17 = scalar_lea.vmem (%p2244_p12), %s2739_s8, %s1908_s26 }
  0x33   : > { %1981 = vset.pattern.permute.xlu0 %v445_v2  ;;  %v462_v4 = vperm.slane %v434_v3, 2  ;;  %v449_v5 = vperm.slane %v434_v3, 1  ;;  %v436_v6 = vperm.slane %v434_v3, 0  ;;  %v475_v8 = vperm.slane %v435_v7, 0  ;;  %v2311_v17 = vld [vmem:[%s2305_s15] sm:$0xff]  ;;  %v2380_v3 = vld [vmem:[%s2305_s15 + $0x18] sm:$0xff] }
  0x34   : > { %v488_v9 = vperm.slane %v435_v7, 1  ;;  %v501_v10 = vperm.slane %v435_v7, 2 }
  0x3a   : > { %473 = vperm.xlu2 %1985, %v462_v4   ;;  %460 = vperm.xlu1 %1983, %v449_v5  }
  0x3b   : > { %447 = vperm.xlu0 %1981, %v436_v6  }
  0x42   : > { %1986 = vset.pattern.permute.xlu2 %v438_v1  ;;  %1984 = vset.pattern.permute.xlu1 %v438_v1 }
  0x43   : > { %1982 = vset.pattern.permute.xlu0 %v438_v1 }
  0x4a   : > { %467 = vperm.xlu2 %1986, %v462_v4   ;;  %454 = vperm.xlu1 %1984, %v449_v5  }
  0x4b   : > { %441 = vperm.xlu0 %1982, %v436_v6  }
  0x52   : > { %1987 = vset.pattern.permute.xlu1 %v445_v2  ;;  %480 = vperm.xlu2 %1986, %v475_v8  }
  0x53   : > { %1988 = vset.pattern.permute.xlu0 %v445_v2 }
  0x5a   : > { %486 = vperm.xlu1 %1987, %v475_v8   ;;  %1990 = vset.pattern.permute.xlu2 %v445_v2 }
  0x5b   : > { %499 = vperm.xlu0 %1988, %v488_v9  }
  0x62   : > { %1989 = vset.pattern.permute.xlu1 %v438_v1  ;;  %512 = vperm.xlu2 %1990, %v501_v10   ;;  %v2368_v1 = vld [vmem:[%s2305_s15 + $0x10] sm:$0xff] }
  0x6a   : > { %493 = vperm.xlu1 %1989, %v488_v9  }
  0x72   : > { %506 = vperm.xlu1 %1989, %v501_v10  }
  0x94   : > { %v474_v12 = vpop.permute.xlu2 %473 }
  0x95   : > { %v2296_v13 = vmul.f32 %v474_v12, %v431_v11 }
  0x97   : > { %693 = vmatpush.msra.mxu2 %v2296_v13  ;;  %v546_v23 = vsel %vm526_vm1, %v2296_v13, 0.0 }
  0xa4   : > { %v468_v15 = vpop.permute.xlu2 %467 }
  0xa5   : > { %v2308_v16 = vmul.f32 %v468_v15, %v430_v14 }
  0xa7   : > { %694 = vmatpush.msra.mxu2 %v2308_v16  ;;  %v545_v24 = vsel %vm526_vm1, %v2308_v16, 0.0 }
  0xa8   : > { %1826 = vmatmul.msk.f32.vlgmr.msra.gmra.mxu2 %vm626_vm0, %v2311_v17  ;;  %v547_v25 = vadd.f32 %v546_v23, %v545_v24 }
  0xaa   : > { %v548_v26 = vrot.slane %v547_v25, 4 }
  0xac   : > { %v461_v18 = vpop.permute.xlu1 %460  ;;  %v481_v27 = vpop.permute.xlu2 %480  ;;  %v549_v28 = vadd.f32 %v548_v26, %v547_v25 }
  0xad   : > { %v448_v19 = vpop.permute.xlu0 %447  ;;  %v2319_v21 = vmul.f32 %v461_v18, %v431_v11  ;;  %v2361_v61 = vmul.f32 %v481_v27, %v432_v54 }
  0xae   : > { %v2321_v22 = vmul.f32 %v448_v19, %v431_v11  ;;  %v550_v35 = vrot.slane %v549_v28, 2 }
  0xaf   : > { %670 = vmatpush.msra.mxu1 %v2319_v21  ;;  %v537_v30 = vsel %vm526_vm1, %v2319_v21, 0.0  ;;  %v554_v5 = vsel %vm526_vm1, %v2361_v61, 0.0 }
  0xb0   : > { %647 = vmatpush.msra.mxu0 %v2321_v22  ;;  %1827 = vmatmul.msk.f32.gmra.mxu2 %vm626_vm0, %v2317_v20  ;;  %v528_v36 = vsel %vm526_vm1, %v2321_v22, 0.0  ;;  %v551_v44 = vadd.f32 %v550_v35, %v549_v28 }
  0xb2   : > { %v552_v50 = vrot.slane %v551_v44, 1 }
  0xb4   : > { %v553_v56 = vadd.f32 %v552_v50, %v551_v44 }
  0xbc   : > { %v455_v29 = vpop.permute.xlu1 %454  ;;  %v513_v43 = vpop.permute.xlu2 %512 }
  0xbd   : > { %v2333_v31 = vmul.f32 %v455_v29, %v430_v14  ;;  %v442_v32 = vpop.permute.xlu0 %441  ;;  %v2350_v46 = vmul.f32 %v513_v43, %v433_v42 }
  0xbe   : > { %v2335_v33 = vmul.f32 %v442_v32, %v430_v14 }
  0xbf   : > { %v536_v34 = vsel %vm526_vm1, %v2333_v31, 0.0  ;;  %671 = vmatpush.msra.mxu1 %v2333_v31  ;;  %v573_v23 = vsel %vm526_vm1, %v2350_v46, 0.0 }
  0xc0   : > { %v538_v37 = vadd.f32 %v537_v30, %v536_v34  ;;  %v527_v38 = vsel %vm526_vm1, %v2335_v33, 0.0  ;;  %648 = vmatpush.msra.mxu0 %v2335_v33  ;;  %1824 = vmatmul.msk.f32.vlgmr.msra.gmra.mxu1 %vm626_vm0, %v2311_v17 }
  0xc1   : > { %v529_v39 = vadd.f32 %v528_v36, %v527_v38  ;;  %1822 = vmatmul.msk.f32.vlgmr.msra.gmra.mxu0 %vm626_vm0, %v2311_v17  ;;  %768 = vmatpush.msrb.mxu1 %v2350_v46 }
  0xc2   : > { %v539_v40 = vrot.slane %v538_v37, 4 }
  0xc3   : > { %v530_v41 = vrot.slane %v529_v39, 4 }
  0xc4   : > { %v540_v45 = vadd.f32 %v539_v40, %v538_v37 }
  0xc5   : > { %v531_v47 = vadd.f32 %v530_v41, %v529_v39 }
  0xc6   : > { %v541_v48 = vrot.slane %v540_v45, 2 }
  0xc7   : > { %v532_v49 = vrot.slane %v531_v47, 2 }
  0xc8   : > { %v542_v51 = vadd.f32 %v541_v48, %v540_v45  ;;  %1825 = vmatmul.msk.f32.gmra.mxu1 %vm626_vm0, %v2317_v20  ;;  %v780_v45 = vld [vmem:[#allocation4 + $0x18] sm:$0xff]  ;;  %v778_v48 = vld [vmem:[#allocation4 + $0x8] sm:$0xff] }
  0xc9   : > { %v533_v52 = vadd.f32 %v532_v49, %v531_v47  ;;  %1823 = vmatmul.msk.f32.gmra.mxu0 %vm626_vm0, %v2317_v20  ;;  %v779_v47 = vld [vmem:[#allocation4 + $0x10] sm:$0xff]  ;;  %833 = vmatpush.msrb.mxu2 %v780_v45  ;;  %v777_v49 = vld [vmem:[#allocation4] sm:$0xff] }
  0xca   : > { %v543_v53 = vrot.slane %v542_v51, 1 }
  0xcb   : > { %v534_v55 = vrot.slane %v533_v52, 1  ;;  %834 = vmatpush.msrb.mxu2 %v779_v47  ;;  %v605_v47 = vld [vmem:[%s2443_s20 + $0x18] sm:$0xff] }
  0xcc   : > { %v544_v57 = vadd.f32 %v543_v53, %v542_v51  ;;  %v487_v58 = vpop.permute.xlu1 %486 }
  0xcd   : > { %v535_v59 = vadd.f32 %v534_v55, %v533_v52  ;;  %v2359_v60 = vmul.f32 %v487_v58, %v433_v42  ;;  %v500_v62 = vpop.permute.xlu0 %499  ;;  %835 = vmatpush.msrb.mxu2 %v778_v48 }
  0xce   : > { %v2363_v63 = vmul.f32 %v500_v62, %v433_v42 }
  0xcf   : > { %v588_v0 = vsel %vm587_vm2, %v544_v57, %v535_v59  ;;  %722 = vmatpush.msra.mxu3 %v2359_v60  ;;  %v555_v4 = vsel %vm526_vm1, %v2359_v60, 0.0  ;;  %836 = vmatpush.msrb.mxu2 %v777_v49 }
  0xd0   : > { %v590_v2 = vsel %vm589_vm3, %v553_v56, %v588_v0  ;;  %745 = vmatpush.msrb.mxu0 %v2363_v63  ;;  %v556_v6 = vadd.f32 %v555_v4, %v554_v5  ;;  %v564_v8 = vsel %vm526_vm1, %v2363_v63, 0.0 }
  0xd1   : > { %596 = vst.msk [vmem:[%s2372_s18] sm:$0x7] %vm595_vm4, %v590_v2  ;;  %723 = vmatpush.msra.mxu3 %v2361_v61  ;;  %v913_v2 = vld [vmem:[#allocation6 + $0x18] sm:$0xff] }
  0xd2   : > { %1828 = vmatmul.msk.f32.vlgmr.msra.gmra.mxu3 %vm626_vm0, %v2368_v1  ;;  %v557_v10 = vrot.slane %v556_v6, 4 }
  0xd3   : > { %966 = vmatpush.msrb.mxu3 %v913_v2 }
  0xd4   : > { %v558_v15 = vadd.f32 %v557_v10, %v556_v6  ;;  %v910_v10 = vld [vmem:[#allocation6] sm:$0xff] }
  0xd6   : > { %v559_v26 = vrot.slane %v558_v15, 2 }
  0xd8   : > { %v560_v32 = vadd.f32 %v559_v26, %v558_v15 }
  0xda   : > { %1829 = vmatmul.msk.f32.gmra.mxu3 %vm626_vm0, %v2380_v3  ;;  %v561_v37 = vrot.slane %v560_v32, 1 }
  0xdc   : > { %v494_v7 = vpop.permute.xlu1 %493  ;;  %v562_v41 = vadd.f32 %v561_v37, %v560_v32  ;;  %v603_v32 = vld [vmem:[%s2443_s20 + $0x8] sm:$0xff] }
  0xdd   : > { %v2390_v9 = vmul.f32 %v494_v7, %v432_v54 }
  0xdf   : > { %v563_v11 = vsel %vm526_vm1, %v2390_v9, 0.0  ;;  %746 = vmatpush.msrb.mxu0 %v2390_v9 }
  0xe0   : > { %v565_v12 = vadd.f32 %v564_v8, %v563_v11  ;;  %1830 = vmatmul.msk.f32.vlgmr.msrb.gmra.mxu0 %vm626_vm0, %v2368_v1  ;;  %v912_v8 = vld [vmem:[#allocation6 + $0x10] sm:$0xff]  ;;  %v602_v11 = vld [vmem:[%s2443_s20] sm:$0xff] }
  0xe1   : > { %967 = vmatpush.msrb.mxu3 %v912_v8 }
  0xe2   : > { %v566_v14 = vrot.slane %v565_v12, 4 }
  0xe4   : > { %v567_v18 = vadd.f32 %v566_v14, %v565_v12  ;;  %v507_v19 = vpop.permute.xlu1 %506 }
  0xe5   : > { %v2399_v24 = vmul.f32 %v507_v19, %v432_v54 }
  0xe6   : > { %v568_v25 = vrot.slane %v567_v18, 2 }
  0xe7   : > { %v572_v27 = vsel %vm526_vm1, %v2399_v24, 0.0  ;;  %769 = vmatpush.msrb.mxu1 %v2399_v24 }
  0xe8   : > { %v574_v28 = vadd.f32 %v573_v23, %v572_v27  ;;  %1831 = vmatmul.msk.f32.gmra.mxu0 %vm626_vm0, %v2380_v3  ;;  %1832 = vmatmul.msk.f32.vlgmr.msrb.gmra.mxu1 %vm626_vm0, %v2368_v1  ;;  %v569_v29 = vadd.f32 %v568_v25, %v567_v18 }
  0xea   : > { %v575_v30 = vrot.slane %v574_v28, 4  ;;  %v570_v35 = vrot.slane %v569_v29, 1 }
  0xec   : > { %v576_v34 = vadd.f32 %v575_v30, %v574_v28  ;;  %v571_v39 = vadd.f32 %v570_v35, %v569_v29 }
  0xee   : > { %v577_v36 = vrot.slane %v576_v34, 2  ;;  %v591_v43 = vsel %vm587_vm2, %v571_v39, %v562_v41 }
  0xf0   : > { %v578_v38 = vadd.f32 %v577_v36, %v576_v34  ;;  %1833 = vmatmul.msk.f32.gmra.mxu1 %vm626_vm0, %v2380_v3 }
  0xf2   : > { %v579_v40 = vrot.slane %v578_v38, 1 }
  0xf4   : > { %v580_v42 = vadd.f32 %v579_v40, %v578_v38 }
  0xf6   : > { %v592_v44 = vsel %vm589_vm3, %v580_v42, %v591_v43 }
  0xf7   : > { %597 = vst.msk [vmem:[%s2372_s18 + $0x4] sm:$0x7] %vm595_vm4, %v592_v44 }
 0x12b   : > { %v696_v58 = vpop.f32.mrf.mxu2 }
 0x133   : > { %v699_v59 = vpop.f32.mrf.mxu2 }
 0x13d   : > { %v673_v54 = vpop.f32.mrf.mxu1 }
 0x13e   : > { %v650_v50 = vpop.f32.mrf.mxu0  ;;  %v674_v55 = vadd.f32 %v673_v54, %v2333_v31 }
 0x13f   : > { %v651_v51 = vadd.f32 %v650_v50, %v2335_v33  ;;  %v697_v33 = vadd.f32 %v696_v58, %v2308_v16 }
 0x141   : > { %1834 = vmatmul.msk.f32.vlgmr.msrb.gmra.mxu2 %vm526_vm1, %v651_v51 }
 0x145   : > { %v676_v56 = vpop.f32.mrf.mxu1 }
 0x146   : > { %v653_v52 = vpop.f32.mrf.mxu0  ;;  %v677_v57 = vadd.f32 %v676_v56, %v2319_v21 }
 0x147   : > { %v654_v53 = vadd.f32 %v653_v52, %v2321_v22  ;;  %v700_v22 = vadd.f32 %v699_v59, %v2296_v13  ;;  %v604_v52 = vld [vmem:[%s2443_s20 + $0x10] sm:$0xff] }
 0x149   : > { %1835 = vmatmul.msk.f32.gmra.mxu2 %vm526_vm1, %v654_v53 }
 0x151   : > { %1836 = vmatmul.msk.f32.gmra.mxu2 %vm526_vm1, %v674_v55 }
 0x155   : > { %v725_v62 = vpop.f32.mrf.mxu3 }
 0x156   : > { %v726_v31 = vadd.f32 %v725_v62, %v2361_v61 }
 0x159   : > { %1837 = vmatmul.msk.f32.gmra.mxu2 %vm526_vm1, %v677_v57 }
 0x15d   : > { %v728_v0 = vpop.f32.mrf.mxu3  ;;  %v748_v4 = vpop.f32.mrf.mxu0 }
 0x15e   : > { %v729_v21 = vadd.f32 %v728_v0, %v2359_v60  ;;  %v749_v16 = vadd.f32 %v748_v4, %v2390_v9  ;;  %v911_v9 = vld [vmem:[#allocation6 + $0x8] sm:$0xff] }
 0x15f   : > { %968 = vmatpush.msrb.mxu3 %v911_v9 }
 0x161   : > { %1838 = vmatmul.msk.f32.gmra.mxu2 %vm526_vm1, %v697_v33  ;;  %969 = vmatpush.msrb.mxu3 %v910_v10 }
 0x165   : > { %v751_v13 = vpop.f32.mrf.mxu0  ;;  %v771_v61 = vpop.f32.mrf.mxu1 }
 0x166   : > { %v752_v5 = vadd.f32 %v751_v13, %v2363_v63  ;;  %v772_v6 = vadd.f32 %v771_v61, %v2399_v24  ;;  %v2132_v63 = vmov 0  }
 0x167   : > { %1992 = vset.pattern.permute.xlu0 %v2132_v63  ;;  %1991 = vset.pattern.permute.xlu2 %v2132_v63 }
 0x168   : > { %1993 = vset.pattern.permute.xlu1 %v2132_v63  ;;  %608 = vperm.xlu0 %1992, %v602_v11  }
 0x169   : > { %1839 = vmatmul.msk.f32.gmra.mxu2 %vm526_vm1, %v700_v22  ;;  %613 = vperm.xlu2 %1991, %v603_v32  }
 0x16a   : > { %623 = vperm.xlu1 %1993, %v605_v47  }
 0x16d   : > { %v774_v60 = vpop.f32.mrf.mxu1 }
 0x16e   : > { %v775_v7 = vadd.f32 %v774_v60, %v2350_v46  ;;  %v2449_v46 = vld [vmem:[%s2736_s5] ss:$0 sm:$0xff] }
 0x16f   : > { %v2481_v60 = vld [vmem:[%s2738_s7] ss:$0 sm:$0xff] }
 0x171   : > { %1840 = vmatmul.msk.f32.gmra.mxu2 %vm526_vm1, %v726_v31  ;;  %618 = vperm.xlu2 %1991, %v604_v52  }
 0x179   : > { %1841 = vmatmul.msk.f32.gmra.mxu2 %vm526_vm1, %v729_v21 }
 0x181   : > { %1842 = vmatmul.msk.f32.gmra.mxu2 %vm526_vm1, %v749_v16 }
 0x189   : > { %1843 = vmatmul.msk.f32.gmra.mxu2 %vm526_vm1, %v752_v5 }
 0x191   : > { %1844 = vmatmul.msk.f32.gmra.mxu2 %vm526_vm1, %v772_v6 }
 0x199   : > { %1845 = vmatmul.msk.f32.gmra.mxu2 %vm526_vm1, %v775_v7 }
 0x1c3   : > { %v2486_v10 = vpop.permute.xlu2 %613 }
 0x1c4   : > { %v838_v12 = vpop.f32.mrf.mxu2 }
 0x1c5   : > { %v839_v14 = vadd.f32 %v2449_v46, %v838_v12 }
 0x1c7   : > { %vm874_vm5 = vcmp.ge.f32.partialorder %v839_v14, 0.0  ;;  %v886_v15 = vmul.f32 0.1, %v839_v14 }
 0x1c9   : > { %v898_v18 = vsel %vm874_vm5, %v839_v14, %v886_v15 }
 0x1ca   : > { %1846 = vmatmul.msk.f32.vlgmr.msrb.gmra.mxu3 %vm526_vm1, %v898_v18 }
 0x1cc   : > { %v841_v19 = vpop.f32.mrf.mxu2 }
 0x1cd   : > { %v842_v23 = vadd.f32 %v2449_v46, %v841_v19 }
 0x1cf   : > { %v887_v24 = vmul.f32 0.1, %v842_v23  ;;  %vm875_vm6 = vcmp.ge.f32.partialorder %v842_v23, 0.0 }
 0x1d1   : > { %v899_v25 = vsel %vm875_vm6, %v842_v23, %v887_v24 }
 0x1d2   : > { %1847 = vmatmul.msk.f32.gmra.mxu3 %vm526_vm1, %v899_v25 }
 0x1d4   : > { %v844_v26 = vpop.f32.mrf.mxu2 }
 0x1d5   : > { %v845_v27 = vadd.f32 %v2449_v46, %v844_v26 }
 0x1d7   : > { %v888_v28 = vmul.f32 0.1, %v845_v27  ;;  %vm876_vm7 = vcmp.ge.f32.partialorder %v845_v27, 0.0 }
 0x1d9   : > { %v900_v29 = vsel %vm876_vm7, %v845_v27, %v888_v28 }
 0x1da   : > { %1848 = vmatmul.msk.f32.gmra.mxu3 %vm526_vm1, %v900_v29  ;;  %v2484_v8 = vpop.permute.xlu0 %608 }
 0x1dc   : > { %v847_v30 = vpop.f32.mrf.mxu2 }
 0x1dd   : > { %v848_v34 = vadd.f32 %v2449_v46, %v847_v30 }
 0x1df   : > { %v889_v35 = vmul.f32 0.1, %v848_v34  ;;  %vm877_vm8 = vcmp.ge.f32.partialorder %v848_v34, 0.0 }
 0x1e1   : > { %v901_v36 = vsel %vm877_vm8, %v848_v34, %v889_v35 }
 0x1e2   : > { %1849 = vmatmul.msk.f32.gmra.mxu3 %vm526_vm1, %v901_v36 }
 0x1e4   : > { %v850_v37 = vpop.f32.mrf.mxu2 }
 0x1e5   : > { %v851_v38 = vadd.f32 %v2449_v46, %v850_v37 }
 0x1e7   : > { %v890_v39 = vmul.f32 0.1, %v851_v38  ;;  %vm878_vm9 = vcmp.ge.f32.partialorder %v851_v38, 0.0 }
 0x1e9   : > { %v902_v40 = vsel %vm878_vm9, %v851_v38, %v890_v39 }
 0x1ea   : > { %1850 = vmatmul.msk.f32.gmra.mxu3 %vm526_vm1, %v902_v40 }
 0x1ec   : > { %v853_v41 = vpop.f32.mrf.mxu2 }
 0x1ed   : > { %v854_v42 = vadd.f32 %v2449_v46, %v853_v41 }
 0x1ef   : > { %v891_v43 = vmul.f32 0.1, %v854_v42  ;;  %vm879_vm10 = vcmp.ge.f32.partialorder %v854_v42, 0.0 }
 0x1f1   : > { %v903_v44 = vsel %vm879_vm10, %v854_v42, %v891_v43 }
 0x1f2   : > { %1851 = vmatmul.msk.f32.gmra.mxu3 %vm526_vm1, %v903_v44 }
 0x1f4   : > { %v856_v45 = vpop.f32.mrf.mxu2 }
 0x1f5   : > { %v857_v48 = vadd.f32 %v2449_v46, %v856_v45 }
 0x1f7   : > { %v892_v49 = vmul.f32 0.1, %v857_v48  ;;  %vm880_vm11 = vcmp.ge.f32.partialorder %v857_v48, 0.0 }
 0x1f9   : > { %v904_v50 = vsel %vm880_vm11, %v857_v48, %v892_v49 }
 0x1fa   : > { %1852 = vmatmul.msk.f32.gmra.mxu3 %vm526_vm1, %v904_v50 }
 0x1fc   : > { %v859_v51 = vpop.f32.mrf.mxu2 }
 0x1fd   : > { %v860_v53 = vadd.f32 %v2449_v46, %v859_v51 }
 0x1ff   : > { %v893_v54 = vmul.f32 0.1, %v860_v53  ;;  %vm881_vm12 = vcmp.ge.f32.partialorder %v860_v53, 0.0 }
 0x201   : > { %v905_v55 = vsel %vm881_vm12, %v860_v53, %v893_v54 }
 0x202   : > { %1853 = vmatmul.msk.f32.gmra.mxu3 %vm526_vm1, %v905_v55 }
 0x204   : > { %v862_v56 = vpop.f32.mrf.mxu2 }
 0x205   : > { %v863_v57 = vadd.f32 %v2449_v46, %v862_v56 }
 0x207   : > { %v894_v58 = vmul.f32 0.1, %v863_v57  ;;  %vm882_vm13 = vcmp.ge.f32.partialorder %v863_v57, 0.0 }
 0x209   : > { %v906_v33 = vsel %vm882_vm13, %v863_v57, %v894_v58 }
 0x20a   : > { %1854 = vmatmul.msk.f32.gmra.mxu3 %vm526_vm1, %v906_v33 }
 0x20c   : > { %v865_v59 = vpop.f32.mrf.mxu2 }
 0x20d   : > { %v866_v22 = vadd.f32 %v2449_v46, %v865_v59 }
 0x20f   : > { %v895_v62 = vmul.f32 0.1, %v866_v22  ;;  %vm883_vm14 = vcmp.ge.f32.partialorder %v866_v22, 0.0 }
 0x211   : > { %v907_v31 = vsel %vm883_vm14, %v866_v22, %v895_v62 }
 0x212   : > { %1855 = vmatmul.msk.f32.gmra.mxu3 %vm526_vm1, %v907_v31 }
 0x214   : > { %v868_v0 = vpop.f32.mrf.mxu2 }
 0x215   : > { %v869_v21 = vadd.f32 %v2449_v46, %v868_v0 }
 0x217   : > { %v896_v2 = vmul.f32 0.1, %v869_v21  ;;  %vm884_vm15 = vcmp.ge.f32.partialorder %v869_v21, 0.0 }
 0x219   : > { %v908_v4 = vsel %vm884_vm15, %v869_v21, %v896_v2 }
 0x21a   : > { %1856 = vmatmul.msk.f32.gmra.mxu3 %vm526_vm1, %v908_v4  ;;  %v2540_v4 = vpop.permute.xlu2 %618 }
 0x21c   : > { %v871_v16 = vpop.f32.mrf.mxu2 }
 0x21d   : > { %v872_v13 = vadd.f32 %v2449_v46, %v871_v16 }
 0x21f   : > { %v897_v5 = vmul.f32 0.1, %v872_v13  ;;  %vm885_vm5 = vcmp.ge.f32.partialorder %v872_v13, 0.0 }
 0x221   : > { %v909_v61 = vsel %vm885_vm5, %v872_v13, %v897_v5 }
 0x222   : > { %1857 = vmatmul.msk.f32.gmra.mxu3 %vm526_vm1, %v909_v61  ;;  %v2542_v61 = vpop.permute.xlu1 %623 }
 0x24d   : > { %v971_v6 = vpop.f32.mrf.mxu3 }
 0x24e   : > { %v972_v7 = vadd.f32 %v2481_v60, %v971_v6 }
 0x250   : > { %v1007_v11 = vmul.f32 %v972_v7, %v2484_v8 }
 0x252   : > { %v1031_v14 = vmul.f32 0.1, %v1007_v11  ;;  %vm1019_vm7 = vcmp.ge.f32.partialorder %v1007_v11, 0.0 }
 0x254   : > { %v2494_v19 = vsel %vm1019_vm7, %v1007_v11, %v1031_v14 }
 0x255   : > { %v974_v9 = vpop.f32.mrf.mxu3  ;;  %v1055_v40 = vsel %vm526_vm1, %v2494_v19, 0.0 }
 0x256   : > { %v975_v63 = vadd.f32 %v2481_v60, %v974_v9 }
 0x258   : > { %v1008_v46 = vmul.f32 %v975_v63, %v2486_v10 }
 0x25a   : > { %vm1020_vm6 = vcmp.ge.f32.partialorder %v1008_v46, 0.0  ;;  %v1032_v12 = vmul.f32 0.1, %v1008_v46 }
 0x25c   : > { %v2491_v15 = vsel %vm1020_vm6, %v1008_v46, %v1032_v12 }
 0x25d   : > { %v977_v18 = vpop.f32.mrf.mxu3  ;;  %1138 = vmatpush.msra.mxu0 %v2491_v15  ;;  %v1056_v36 = vsel %vm526_vm1, %v2491_v15, 0.0 }
 0x25e   : > { %v978_v23 = vadd.f32 %v2481_v60, %v977_v18  ;;  %v1057_v41 = vadd.f32 %v1056_v36, %v1055_v40 }
 0x25f   : > { %1139 = vmatpush.msra.mxu0 %v2494_v19 }
 0x260   : > { %1860 = vmatmul.msk.f32.vlgmr.msra.gmra.mxu0 %vm626_vm0, %v2311_v17  ;;  %v1009_v24 = vmul.f32 %v978_v23, %v2484_v8  ;;  %v1058_v44 = vrot.slane %v1057_v41, 4 }
 0x262   : > { %v1033_v27 = vmul.f32 0.1, %v1009_v24  ;;  %vm1021_vm8 = vcmp.ge.f32.partialorder %v1009_v24, 0.0  ;;  %v1059_v51 = vadd.f32 %v1058_v44, %v1057_v41 }
 0x264   : > { %v2505_v30 = vsel %vm1021_vm8, %v1009_v24, %v1033_v27  ;;  %v1060_v56 = vrot.slane %v1059_v51, 2 }
 0x265   : > { %v980_v25 = vpop.f32.mrf.mxu3  ;;  %v1064_v38 = vsel %vm526_vm1, %v2505_v30, 0.0 }
 0x266   : > { %v981_v26 = vadd.f32 %v2481_v60, %v980_v25  ;;  %v1061_v31 = vadd.f32 %v1060_v56, %v1059_v51 }
 0x268   : > { %v1010_v28 = vmul.f32 %v981_v26, %v2486_v10  ;;  %1861 = vmatmul.msk.f32.gmra.mxu0 %vm626_vm0, %v2317_v20  ;;  %v1062_v13 = vrot.slane %v1061_v31, 1 }
 0x26a   : > { %v1034_v29 = vmul.f32 0.1, %v1010_v28  ;;  %vm1022_vm9 = vcmp.ge.f32.partialorder %v1010_v28, 0.0  ;;  %v1063_v46 = vadd.f32 %v1062_v13, %v1061_v31 }
 0x26c   : > { %v2507_v32 = vsel %vm1022_vm9, %v1010_v28, %v1034_v29 }
 0x26d   : > { %v983_v34 = vpop.f32.mrf.mxu3  ;;  %v1065_v35 = vsel %vm526_vm1, %v2507_v32, 0.0  ;;  %1161 = vmatpush.msra.mxu1 %v2507_v32 }
 0x26e   : > { %v984_v37 = vadd.f32 %v2481_v60, %v983_v34  ;;  %v1066_v39 = vadd.f32 %v1065_v35, %v1064_v38 }
 0x26f   : > { %1162 = vmatpush.msra.mxu1 %v2505_v30 }
 0x270   : > { %1862 = vmatmul.msk.f32.vlgmr.msra.gmra.mxu1 %vm626_vm0, %v2311_v17  ;;  %v1011_v42 = vmul.f32 %v984_v37, %v2484_v8  ;;  %v1067_v43 = vrot.slane %v1066_v39, 4 }
 0x272   : > { %v1035_v48 = vmul.f32 0.1, %v1011_v42  ;;  %v1068_v49 = vadd.f32 %v1067_v43, %v1066_v39  ;;  %vm1023_vm10 = vcmp.ge.f32.partialorder %v1011_v42, 0.0 }
 0x274   : > { %v2527_v53 = vsel %vm1023_vm10, %v1011_v42, %v1035_v48  ;;  %v1069_v54 = vrot.slane %v1068_v49, 2  ;;  %v1266_v42 = vld [vmem:[#allocation4 + $0x38] sm:$0xff]  ;;  %v1265_v48 = vld [vmem:[#allocation4 + $0x30] sm:$0xff] }
 0x275   : > { %v986_v45 = vpop.f32.mrf.mxu3  ;;  %v1073_v33 = vsel %vm526_vm1, %v2527_v53, 0.0  ;;  %1909 = vmatpush.msra.mxu2 %v1266_v42 }
 0x276   : > { %v987_v47 = vadd.f32 %v2481_v60, %v986_v45  ;;  %v1070_v22 = vadd.f32 %v1069_v54, %v1068_v49 }
 0x277   : > { %1910 = vmatpush.msra.mxu2 %v1265_v48 }
 0x278   : > { %v1012_v50 = vmul.f32 %v987_v47, %v2486_v10  ;;  %1863 = vmatmul.msk.f32.gmra.mxu1 %vm626_vm0, %v2317_v20  ;;  %v1071_v2 = vrot.slane %v1070_v22, 1 }
 0x27a   : > { %v1036_v52 = vmul.f32 0.1, %v1012_v50  ;;  %vm1024_vm11 = vcmp.ge.f32.partialorder %v1012_v50, 0.0  ;;  %v1072_v63 = vadd.f32 %v1071_v2, %v1070_v22 }
 0x27c   : > { %v2529_v55 = vsel %vm1024_vm11, %v1012_v50, %v1036_v52  ;;  %v1115_v23 = vsel %vm587_vm2, %v1072_v63, %v1063_v46 }
 0x27d   : > { %v989_v57 = vpop.f32.mrf.mxu3  ;;  %v1074_v58 = vsel %vm526_vm1, %v2529_v55, 0.0  ;;  %1184 = vmatpush.msrb.mxu0 %v2529_v55 }
 0x27e   : > { %v1075_v59 = vadd.f32 %v1074_v58, %v1073_v33  ;;  %v990_v0 = vadd.f32 %v2481_v60, %v989_v57 }
 0x27f   : > { %1185 = vmatpush.msrb.mxu0 %v2527_v53 }
 0x280   : > { %v1076_v62 = vrot.slane %v1075_v59, 4  ;;  %1864 = vmatmul.msk.f32.vlgmr.msrb.gmra.mxu0 %vm626_vm0, %v2311_v17  ;;  %v1013_v6 = vmul.f32 %v990_v0, %v2540_v4 }
 0x282   : > { %v1077_v21 = vadd.f32 %v1076_v62, %v1075_v59  ;;  %v1037_v18 = vmul.f32 0.1, %v1013_v6  ;;  %vm1025_vm13 = vcmp.ge.f32.partialorder %v1013_v6, 0.0 }
 0x284   : > { %v1078_v16 = vrot.slane %v1077_v21, 2 }
 0x285   : > { %v992_v5 = vpop.f32.mrf.mxu3 }
 0x286   : > { %v1079_v7 = vadd.f32 %v1078_v16, %v1077_v21  ;;  %v993_v9 = vadd.f32 %v2481_v60, %v992_v5 }
 0x288   : > { %v1080_v17 = vrot.slane %v1079_v7, 1  ;;  %1865 = vmatmul.msk.f32.gmra.mxu0 %vm626_vm0, %v2317_v20  ;;  %v1014_v11 = vmul.f32 %v993_v9, %v2542_v61  ;;  %v2556_v20 = vsel %vm1025_vm13, %v1013_v6, %v1037_v18 }
 0x289   : > { %v1082_v49 = vsel %vm526_vm1, %v2556_v20, 0.0 }
 0x28a   : > { %v1081_v12 = vadd.f32 %v1080_v17, %v1079_v7  ;;  %vm1026_vm12 = vcmp.ge.f32.partialorder %v1014_v11, 0.0  ;;  %v1038_v14 = vmul.f32 0.1, %v1014_v11 }
 0x28c   : > { %v1116_v24 = vsel %vm589_vm3, %v1081_v12, %v1115_v23  ;;  %v2551_v25 = vsel %vm1026_vm12, %v1014_v11, %v1038_v14 }
 0x28d   : > { %1858 = vst.msk [vmem:[%s2372_s18 + $0x8] sm:$0x7] %vm595_vm4, %v1116_v24  ;;  %v995_v26 = vpop.f32.mrf.mxu3  ;;  %1207 = vmatpush.msrb.mxu1 %v2551_v25  ;;  %v1083_v43 = vsel %vm526_vm1, %v2551_v25, 0.0 }
 0x28e   : > { %v996_v27 = vadd.f32 %v2481_v60, %v995_v26  ;;  %v1084_v50 = vadd.f32 %v1083_v43, %v1082_v49 }
 0x28f   : > { %1208 = vmatpush.msrb.mxu1 %v2556_v20 }
 0x290   : > { %1866 = vmatmul.msk.f32.vlgmr.msrb.gmra.mxu1 %vm626_vm0, %v2368_v1  ;;  %v1015_v28 = vmul.f32 %v996_v27, %v2540_v4  ;;  %v1085_v54 = vrot.slane %v1084_v50, 4  ;;  %v1264_v27 = vld [vmem:[#allocation4 + $0x28] sm:$0xff] }
 0x291   : > { %1911 = vmatpush.msra.mxu2 %v1264_v27 }
 0x292   : > { %v1039_v35 = vmul.f32 0.1, %v1015_v28  ;;  %vm1027_vm14 = vcmp.ge.f32.partialorder %v1015_v28, 0.0  ;;  %v1086_v22 = vadd.f32 %v1085_v54, %v1084_v50 }
 0x294   : > { %v2567_v38 = vsel %vm1027_vm14, %v1015_v28, %v1039_v35  ;;  %v1087_v2 = vrot.slane %v1086_v22, 2 }
 0x295   : > { %v998_v29 = vpop.f32.mrf.mxu3  ;;  %v1091_v45 = vsel %vm526_vm1, %v2567_v38, 0.0 }
 0x296   : > { %v999_v34 = vadd.f32 %v2481_v60, %v998_v29  ;;  %v1088_v7 = vadd.f32 %v1087_v2, %v1086_v22 }
 0x298   : > { %v1016_v36 = vmul.f32 %v999_v34, %v2542_v61  ;;  %1867 = vmatmul.msk.f32.gmra.mxu1 %vm626_vm0, %v2380_v3  ;;  %v1089_v11 = vrot.slane %v1088_v7, 1 }
 0x29a   : > { %v1040_v37 = vmul.f32 0.1, %v1016_v36  ;;  %vm1028_vm15 = vcmp.ge.f32.partialorder %v1016_v36, 0.0  ;;  %v1090_v18 = vadd.f32 %v1089_v11, %v1088_v7 }
 0x29c   : > { %v2569_v39 = vsel %vm1028_vm15, %v1016_v36, %v1040_v37 }
 0x29d   : > { %v1001_v40 = vpop.f32.mrf.mxu3  ;;  %v1092_v41 = vsel %vm526_vm1, %v2569_v39, 0.0  ;;  %1230 = vmatpush.msra.mxu0 %v2569_v39 }
 0x29e   : > { %v1002_v44 = vadd.f32 %v2481_v60, %v1001_v40  ;;  %v1093_v47 = vadd.f32 %v1092_v41, %v1091_v45  ;;  %v1401_v45 = vld [vmem:[#allocation6 + $0x38] sm:$0xff] }
 0x29f   : > { %1231 = vmatpush.msra.mxu0 %v2567_v38  ;;  %1913 = vmatpush.msra.mxu3 %v1401_v45 }
 0x2a0   : > { %1868 = vmatmul.msk.f32.vlgmr.msra.gmra.mxu0 %vm626_vm0, %v2368_v1  ;;  %v1017_v51 = vmul.f32 %v1002_v44, %v2540_v4  ;;  %v1094_v52 = vrot.slane %v1093_v47, 4 }
 0x2a1   : > { %1320 = vmatpush.msrb.mxu0 %v1266_v42 }
 0x2a2   : > { %v1041_v58 = vmul.f32 0.1, %v1017_v51  ;;  %v1095_v33 = vadd.f32 %v1094_v52, %v1093_v47  ;;  %vm1029_vm5 = vcmp.ge.f32.partialorder %v1017_v51, 0.0  ;;  %v1398_v52 = vld [vmem:[#allocation6 + $0x20] sm:$0xff] }
 0x2a3   : > { %1321 = vmatpush.msrb.mxu0 %v1265_v48 }
 0x2a4   : > { %v2589_v31 = vsel %vm1029_vm5, %v1017_v51, %v1041_v58  ;;  %v1096_v0 = vrot.slane %v1095_v33, 2  ;;  %v1400_v51 = vld [vmem:[#allocation6 + $0x30] sm:$0xff] }
 0x2a5   : > { %v1004_v56 = vpop.f32.mrf.mxu3  ;;  %v1100_v16 = vsel %vm526_vm1, %v2589_v31, 0.0  ;;  %1322 = vmatpush.msrb.mxu0 %v1264_v27  ;;  %1914 = vmatpush.msra.mxu3 %v1400_v51 }
 0x2a6   : > { %v1005_v57 = vadd.f32 %v2481_v60, %v1004_v56  ;;  %v1097_v5 = vadd.f32 %v1096_v0, %v1095_v33 }
 0x2a8   : > { %v1018_v59 = vmul.f32 %v1005_v57, %v2542_v61  ;;  %1869 = vmatmul.msk.f32.gmra.mxu0 %vm626_vm0, %v2380_v3  ;;  %v1098_v63 = vrot.slane %v1097_v5, 1 }
 0x2aa   : > { %v1042_v62 = vmul.f32 0.1, %v1018_v59  ;;  %vm1030_vm6 = vcmp.ge.f32.partialorder %v1018_v59, 0.0  ;;  %v1099_v12 = vadd.f32 %v1098_v63, %v1097_v5 }
 0x2ac   : > { %v2591_v21 = vsel %vm1030_vm6, %v1018_v59, %v1042_v62  ;;  %v1117_v24 = vsel %vm587_vm2, %v1099_v12, %v1090_v18 }
 0x2ad   : > { %v1101_v60 = vsel %vm526_vm1, %v2591_v21, 0.0  ;;  %1253 = vmatpush.msra.mxu1 %v2591_v21 }
 0x2ae   : > { %v1102_v13 = vadd.f32 %v1101_v60, %v1100_v16 }
 0x2af   : > { %1254 = vmatpush.msra.mxu1 %v2589_v31 }
 0x2b0   : > { %v1103_v6 = vrot.slane %v1102_v13, 4  ;;  %1870 = vmatmul.msk.f32.vlgmr.msra.gmra.mxu1 %vm626_vm0, %v2368_v1  ;;  %v1263_v1 = vld [vmem:[#allocation4 + $0x20] sm:$0xff] }
 0x2b1   : > { %1323 = vmatpush.msrb.mxu0 %v1263_v1  ;;  %1912 = vmatpush.msra.mxu2 %v1263_v1 }
 0x2b2   : > { %v1104_v9 = vadd.f32 %v1103_v6, %v1102_v13  ;;  %1455 = vmatpush.msrb.mxu1 %v1401_v45 }
 0x2b4   : > { %v1105_v17 = vrot.slane %v1104_v9, 2  ;;  %1456 = vmatpush.msrb.mxu1 %v1400_v51 }
 0x2b6   : > { %v1106_v46 = vadd.f32 %v1105_v17, %v1104_v9 }
 0x2b8   : > { %v1107_v14 = vrot.slane %v1106_v46, 1  ;;  %1871 = vmatmul.msk.f32.gmra.mxu1 %vm626_vm0, %v2380_v3 }
 0x2ba   : > { %v1108_v23 = vadd.f32 %v1107_v14, %v1106_v46 }
 0x2bc   : > { %v1118_v26 = vsel %vm589_vm3, %v1108_v23, %v1117_v24 }
 0x2bd   : > { %1859 = vst.msk [vmem:[%s2372_s18 + $0xc] sm:$0x7] %vm595_vm4, %v1118_v26 }
 0x2dd   : > { %v1141_v28 = vpop.f32.mrf.mxu0 }
 0x2de   : > { %v1142_v29 = vadd.f32 %v1141_v28, %v2494_v19 }
 0x2e0   : > { %1873 = vmatmul.msk.f32.vlgmr.msrb.gmra.mxu0 %vm526_vm1, %v1142_v29 }
 0x2e5   : > { %v1144_v3 = vpop.f32.mrf.mxu0 }
 0x2e6   : > { %v1145_v34 = vadd.f32 %v1144_v3, %v2491_v15 }
 0x2e8   : > { %1874 = vmatmul.msk.f32.gmra.mxu0 %vm526_vm1, %v1145_v34 }
 0x2ed   : > { %v1164_v35 = vpop.f32.mrf.mxu1 }
 0x2ee   : > { %v1165_v36 = vadd.f32 %v1164_v35, %v2505_v30 }
 0x2f0   : > { %1875 = vmatmul.msk.f32.gmra.mxu0 %vm526_vm1, %v1165_v36 }
 0x2f5   : > { %v1167_v37 = vpop.f32.mrf.mxu1 }
 0x2f6   : > { %v1168_v40 = vadd.f32 %v1167_v37, %v2507_v32 }
 0x2f8   : > { %1876 = vmatmul.msk.f32.gmra.mxu0 %vm526_vm1, %v1168_v40 }
 0x2fd   : > { %v1187_v41 = vpop.f32.mrf.mxu0 }
 0x2fe   : > { %v1188_v19 = vadd.f32 %v1187_v41, %v2527_v53 }
 0x300   : > { %1877 = vmatmul.msk.f32.gmra.mxu0 %vm526_vm1, %v1188_v19 }
 0x305   : > { %v1190_v42 = vpop.f32.mrf.mxu0 }
 0x306   : > { %v1191_v15 = vadd.f32 %v1190_v42, %v2529_v55 }
 0x308   : > { %1878 = vmatmul.msk.f32.gmra.mxu0 %vm526_vm1, %v1191_v15 }
 0x30d   : > { %v1210_v43 = vpop.f32.mrf.mxu1 }
 0x30e   : > { %v1211_v30 = vadd.f32 %v1210_v43, %v2556_v20 }
 0x310   : > { %1879 = vmatmul.msk.f32.gmra.mxu0 %vm526_vm1, %v1211_v30 }
 0x315   : > { %v1213_v44 = vpop.f32.mrf.mxu1 }
 0x316   : > { %v1214_v32 = vadd.f32 %v1213_v44, %v2551_v25 }
 0x318   : > { %1880 = vmatmul.msk.f32.gmra.mxu0 %vm526_vm1, %v1214_v32 }
 0x31d   : > { %v1233_v53 = vpop.f32.mrf.mxu0 }
 0x31e   : > { %v1234_v47 = vadd.f32 %v1233_v53, %v2567_v38  ;;  %v1399_v38 = vld [vmem:[#allocation6 + $0x28] sm:$0xff] }
 0x31f   : > { %1457 = vmatpush.msrb.mxu1 %v1399_v38  ;;  %1915 = vmatpush.msra.mxu3 %v1399_v38 }
 0x320   : > { %1881 = vmatmul.msk.f32.vlgmr.msra.gmra.mxu2 %vm526_vm1, %v1234_v47 }
 0x321   : > { %1458 = vmatpush.msrb.mxu1 %v1398_v52  ;;  %1916 = vmatpush.msra.mxu3 %v1398_v52 }
 0x325   : > { %v1236_v55 = vpop.f32.mrf.mxu0 }
 0x326   : > { %v1237_v48 = vadd.f32 %v1236_v55, %v2569_v39  ;;  %v2634_v39 = vld [vmem:[%s2736_s5 + $0x1] ss:$0 sm:$0xff] }
 0x327   : > { %v2663_v55 = vld [vmem:[%s2738_s7 + $0x1] ss:$0 sm:$0xff] }
 0x328   : > { %1882 = vmatmul.msk.f32.gmra.mxu2 %vm526_vm1, %v1237_v48 }
 0x32d   : > { %v1256_v20 = vpop.f32.mrf.mxu1 }
 0x32e   : > { %v1257_v49 = vadd.f32 %v1256_v20, %v2589_v31 }
 0x330   : > { %1883 = vmatmul.msk.f32.gmra.mxu2 %vm526_vm1, %v1257_v49 }
 0x335   : > { %v1259_v25 = vpop.f32.mrf.mxu1 }
 0x336   : > { %v1260_v50 = vadd.f32 %v1259_v25, %v2591_v21 }
 0x338   : > { %1884 = vmatmul.msk.f32.gmra.mxu2 %vm526_vm1, %v1260_v50 }
 0x35d   : > { %v1325_v54 = vpop.f32.mrf.mxu0 }
 0x35e   : > { %v1326_v56 = vadd.f32 %v2634_v39, %v1325_v54 }
 0x360   : > { %vm1361_vm0 = vcmp.ge.f32.partialorder %v1326_v56, 0.0  ;;  %v1373_v57 = vmul.f32 0.1, %v1326_v56 }
 0x362   : > { %v1385_v58 = vsel %vm1361_vm0, %v1326_v56, %v1373_v57 }
 0x363   : > { %1886 = vmatmul.msk.f32.vlgmr.msrb.gmra.mxu1 %vm526_vm1, %v1385_v58 }
 0x365   : > { %v1328_v33 = vpop.f32.mrf.mxu0 }
 0x366   : > { %v1329_v59 = vadd.f32 %v2634_v39, %v1328_v33 }
 0x368   : > { %v1374_v22 = vmul.f32 0.1, %v1329_v59  ;;  %vm1362_vm7 = vcmp.ge.f32.partialorder %v1329_v59, 0.0 }
 0x36a   : > { %v1386_v62 = vsel %vm1362_vm7, %v1329_v59, %v1374_v22 }
 0x36b   : > { %1887 = vmatmul.msk.f32.gmra.mxu1 %vm526_vm1, %v1386_v62 }
 0x36d   : > { %v1331_v31 = vpop.f32.mrf.mxu0 }
 0x36e   : > { %v1332_v0 = vadd.f32 %v2634_v39, %v1331_v31 }
 0x370   : > { %v1375_v21 = vmul.f32 0.1, %v1332_v0  ;;  %vm1363_vm8 = vcmp.ge.f32.partialorder %v1332_v0, 0.0 }
 0x372   : > { %v1387_v2 = vsel %vm1363_vm8, %v1332_v0, %v1375_v21 }
 0x373   : > { %1888 = vmatmul.msk.f32.gmra.mxu1 %vm526_vm1, %v1387_v2 }
 0x375   : > { %v1334_v60 = vpop.f32.mrf.mxu0 }
 0x376   : > { %v1335_v16 = vadd.f32 %v2634_v39, %v1334_v60 }
 0x378   : > { %v1376_v13 = vmul.f32 0.1, %v1335_v16  ;;  %vm1364_vm9 = vcmp.ge.f32.partialorder %v1335_v16, 0.0 }
 0x37a   : > { %v1388_v5 = vsel %vm1364_vm9, %v1335_v16, %v1376_v13 }
 0x37b   : > { %1889 = vmatmul.msk.f32.gmra.mxu1 %vm526_vm1, %v1388_v5 }
 0x37d   : > { %v1337_v6 = vpop.f32.mrf.mxu0 }
 0x37e   : > { %v1338_v7 = vadd.f32 %v2634_v39, %v1337_v6 }
 0x380   : > { %v1377_v9 = vmul.f32 0.1, %v1338_v7  ;;  %vm1365_vm10 = vcmp.ge.f32.partialorder %v1338_v7, 0.0 }
 0x382   : > { %v1389_v63 = vsel %vm1365_vm10, %v1338_v7, %v1377_v9 }
 0x383   : > { %1890 = vmatmul.msk.f32.gmra.mxu1 %vm526_vm1, %v1389_v63 }
 0x385   : > { %v1340_v17 = vpop.f32.mrf.mxu0 }
 0x386   : > { %v1341_v11 = vadd.f32 %v2634_v39, %v1340_v17 }
 0x388   : > { %v1378_v46 = vmul.f32 0.1, %v1341_v11  ;;  %vm1366_vm11 = vcmp.ge.f32.partialorder %v1341_v11, 0.0 }
 0x38a   : > { %v1390_v12 = vsel %vm1366_vm11, %v1341_v11, %v1378_v46 }
 0x38b   : > { %1891 = vmatmul.msk.f32.gmra.mxu1 %vm526_vm1, %v1390_v12 }
 0x38d   : > { %v1343_v14 = vpop.f32.mrf.mxu0 }
 0x38e   : > { %v1344_v18 = vadd.f32 %v2634_v39, %v1343_v14 }
 0x390   : > { %v1379_v23 = vmul.f32 0.1, %v1344_v18  ;;  %vm1367_vm12 = vcmp.ge.f32.partialorder %v1344_v18, 0.0 }
 0x392   : > { %v1391_v24 = vsel %vm1367_vm12, %v1344_v18, %v1379_v23 }
 0x393   : > { %1892 = vmatmul.msk.f32.gmra.mxu1 %vm526_vm1, %v1391_v24 }
 0x395   : > { %v1346_v26 = vpop.f32.mrf.mxu0 }
 0x396   : > { %v1347_v27 = vadd.f32 %v2634_v39, %v1346_v26 }
 0x398   : > { %v1380_v1 = vmul.f32 0.1, %v1347_v27  ;;  %vm1368_vm13 = vcmp.ge.f32.partialorder %v1347_v27, 0.0 }
 0x39a   : > { %v1392_v28 = vsel %vm1368_vm13, %v1347_v27, %v1380_v1 }
 0x39b   : > { %1893 = vmatmul.msk.f32.gmra.mxu1 %vm526_vm1, %v1392_v28 }
 0x3a3   : > { %v1349_v29 = vpop.f32.mrf.mxu2 }
 0x3a4   : > { %v1350_v3 = vadd.f32 %v2634_v39, %v1349_v29 }
 0x3a6   : > { %vm1369_vm14 = vcmp.ge.f32.partialorder %v1350_v3, 0.0  ;;  %v1381_v34 = vmul.f32 0.1, %v1350_v3 }
 0x3a8   : > { %v1393_v35 = vsel %vm1369_vm14, %v1350_v3, %v1381_v34 }
 0x3a9   : > { %1894 = vmatmul.msk.f32.vlgmr.msra.gmra.mxu3 %vm526_vm1, %v1393_v35 }
 0x3ab   : > { %v1352_v36 = vpop.f32.mrf.mxu2 }
 0x3ac   : > { %v1353_v37 = vadd.f32 %v2634_v39, %v1352_v36 }
 0x3ae   : > { %v1382_v40 = vmul.f32 0.1, %v1353_v37  ;;  %vm1370_vm15 = vcmp.ge.f32.partialorder %v1353_v37, 0.0 }
 0x3b0   : > { %v1394_v41 = vsel %vm1370_vm15, %v1353_v37, %v1382_v40 }
 0x3b1   : > { %1895 = vmatmul.msk.f32.gmra.mxu3 %vm526_vm1, %v1394_v41 }
 0x3b3   : > { %v1355_v19 = vpop.f32.mrf.mxu2 }
 0x3b4   : > { %v1356_v42 = vadd.f32 %v2634_v39, %v1355_v19 }
 0x3b6   : > { %v1383_v15 = vmul.f32 0.1, %v1356_v42  ;;  %vm1371_vm5 = vcmp.ge.f32.partialorder %v1356_v42, 0.0 }
 0x3b8   : > { %v1395_v43 = vsel %vm1371_vm5, %v1356_v42, %v1383_v15 }
 0x3b9   : > { %1896 = vmatmul.msk.f32.gmra.mxu3 %vm526_vm1, %v1395_v43 }
 0x3bb   : > { %v1358_v30 = vpop.f32.mrf.mxu2 }
 0x3bc   : > { %v1359_v44 = vadd.f32 %v2634_v39, %v1358_v30 }
 0x3be   : > { %v1384_v32 = vmul.f32 0.1, %v1359_v44  ;;  %vm1372_vm6 = vcmp.ge.f32.partialorder %v1359_v44, 0.0 }
 0x3c0   : > { %v1396_v45 = vsel %vm1372_vm6, %v1359_v44, %v1384_v32 }
 0x3c1   : > { %1897 = vmatmul.msk.f32.gmra.mxu3 %vm526_vm1, %v1396_v45 }
 0x3e0   : > { %v1460_v53 = vpop.f32.mrf.mxu1 }
 0x3e1   : > { %v1461_v25 = vadd.f32 %v2663_v55, %v1460_v53 }
 0x3e3   : > { %v1496_v38 = vmul.f32 %v1461_v25, %v2484_v8 }
 0x3e5   : > { %v1520_v58 = vmul.f32 0.1, %v1496_v38  ;;  %vm1508_vm8 = vcmp.ge.f32.partialorder %v1496_v38, 0.0 }
 0x3e7   : > { %v1532_v31 = vsel %vm1508_vm8, %v1496_v38, %v1520_v58 }
 0x3e8   : > { %v1463_v47 = vpop.f32.mrf.mxu1  ;;  %v1544_v5 = vsel %vm526_vm1, %v1532_v31, 0.0 }
 0x3e9   : > { %v1464_v20 = vadd.f32 %v2663_v55, %v1463_v47 }
 0x3eb   : > { %v1497_v50 = vmul.f32 %v1464_v20, %v2486_v10 }
 0x3ed   : > { %v1521_v54 = vmul.f32 0.1, %v1497_v50  ;;  %vm1509_vm0 = vcmp.ge.f32.partialorder %v1497_v50, 0.0 }
 0x3ef   : > { %v1533_v59 = vsel %vm1509_vm0, %v1497_v50, %v1521_v54 }
 0x3f0   : > { %v1466_v48 = vpop.f32.mrf.mxu1  ;;  %v1545_v2 = vsel %vm526_vm1, %v1533_v59, 0.0 }
 0x3f1   : > { %v1467_v49 = vadd.f32 %v2663_v55, %v1466_v48  ;;  %v1546_v6 = vadd.f32 %v1545_v2, %v1544_v5 }
 0x3f3   : > { %v1498_v51 = vmul.f32 %v1467_v49, %v2484_v8  ;;  %v1547_v63 = vrot.slane %v1546_v6, 4 }
 0x3f5   : > { %v1522_v56 = vmul.f32 0.1, %v1498_v51  ;;  %vm1510_vm7 = vcmp.ge.f32.partialorder %v1498_v51, 0.0  ;;  %v1548_v18 = vadd.f32 %v1547_v63, %v1546_v6 }
 0x3f7   : > { %v1534_v22 = vsel %vm1510_vm7, %v1498_v51, %v1522_v56  ;;  %v1549_v1 = vrot.slane %v1548_v18, 2 }
 0x3f8   : > { %v1469_v52 = vpop.f32.mrf.mxu1  ;;  %v1553_v60 = vsel %vm526_vm1, %v1534_v22, 0.0 }
 0x3f9   : > { %v1470_v39 = vadd.f32 %v2663_v55, %v1469_v52  ;;  %v1550_v35 = vadd.f32 %v1549_v1, %v1548_v18 }
 0x3fb   : > { %v1499_v57 = vmul.f32 %v1470_v39, %v2486_v10 }
 0x3fd   : > { %vm1511_vm9 = vcmp.ge.f32.partialorder %v1499_v57, 0.0  ;;  %v1523_v33 = vmul.f32 0.1, %v1499_v57 }
 0x3ff   : > { %v1535_v62 = vsel %vm1511_vm9, %v1499_v57, %v1523_v33 }
 0x400   : > { %v1554_v0 = vsel %vm526_vm1, %v1535_v62, 0.0  ;;  %v1472_v21 = vpop.f32.mrf.mxu1 }
 0x401   : > { %v1473_v16 = vadd.f32 %v2663_v55, %v1472_v21  ;;  %v1555_v13 = vadd.f32 %v1554_v0, %v1553_v60 }
 0x403   : > { %v1500_v7 = vmul.f32 %v1473_v16, %v2484_v8  ;;  %v1556_v9 = vrot.slane %v1555_v13, 4 }
 0x405   : > { %v1524_v11 = vmul.f32 0.1, %v1500_v7  ;;  %v1557_v12 = vadd.f32 %v1556_v9, %v1555_v13  ;;  %vm1512_vm10 = vcmp.ge.f32.partialorder %v1500_v7, 0.0 }
 0x407   : > { %v1536_v23 = vsel %vm1512_vm10, %v1500_v7, %v1524_v11  ;;  %v1558_v26 = vrot.slane %v1557_v12, 2 }
 0x408   : > { %v1475_v17 = vpop.f32.mrf.mxu1  ;;  %v1562_v28 = vsel %vm526_vm1, %v1536_v23, 0.0 }
 0x409   : > { %v1476_v46 = vadd.f32 %v2663_v55, %v1475_v17  ;;  %v1559_v3 = vadd.f32 %v1558_v26, %v1557_v12 }
 0x40b   : > { %v1501_v14 = vmul.f32 %v1476_v46, %v2486_v10  ;;  %v1560_v37 = vrot.slane %v1559_v3, 1  ;;  %v1551_v10 = vrot.slane %v1550_v35, 1 }
 0x40d   : > { %vm1513_vm11 = vcmp.ge.f32.partialorder %v1501_v14, 0.0  ;;  %v1525_v24 = vmul.f32 0.1, %v1501_v14  ;;  %v1561_v19 = vadd.f32 %v1560_v37, %v1559_v3  ;;  %v1552_v15 = vadd.f32 %v1551_v10, %v1550_v35 }
 0x40f   : > { %v1537_v27 = vsel %vm1513_vm11, %v1501_v14, %v1525_v24  ;;  %v1604_v30 = vsel %vm587_vm2, %v1561_v19, %v1552_v15  ;;  %v1643_v15 = vld [vmem:[%s2372_s18 + $0x8] sm:$0xff] (%p2244_p12)  }
 0x410   : > { %v1563_v8 = vsel %vm526_vm1, %v1537_v27, 0.0  ;;  %v1478_v32 = vpop.f32.mrf.mxu1  ;;  %1644 = vst [vmem:[%s1622_s17 + $0x10] sm:$0xff] (%p2244_p12), %v1643_v15  }
 0x411   : > { %v1564_v29 = vadd.f32 %v1563_v8, %v1562_v28  ;;  %v1479_v20 = vadd.f32 %v2663_v55, %v1478_v32 }
 0x413   : > { %v1565_v34 = vrot.slane %v1564_v29, 4  ;;  %v1502_v50 = vmul.f32 %v1479_v20, %v2540_v4 }
 0x415   : > { %v1566_v36 = vadd.f32 %v1565_v34, %v1564_v29  ;;  %v1526_v56 = vmul.f32 0.1, %v1502_v50  ;;  %vm1514_vm14 = vcmp.ge.f32.partialorder %v1502_v50, 0.0 }
 0x417   : > { %v1567_v40 = vrot.slane %v1566_v36, 2  ;;  %v1538_v22 = vsel %vm1514_vm14, %v1502_v50, %v1526_v56 }
 0x418   : > { %v1481_v45 = vpop.f32.mrf.mxu1  ;;  %v1571_v16 = vsel %vm526_vm1, %v1538_v22, 0.0 }
 0x419   : > { %v1568_v41 = vadd.f32 %v1567_v40, %v1566_v36  ;;  %v1482_v47 = vadd.f32 %v2663_v55, %v1481_v45 }
 0x41b   : > { %v1569_v42 = vrot.slane %v1568_v41, 1  ;;  %v1503_v49 = vmul.f32 %v1482_v47, %v2542_v61 }
 0x41d   : > { %v1570_v43 = vadd.f32 %v1569_v42, %v1568_v41  ;;  %v1527_v52 = vmul.f32 0.1, %v1503_v49  ;;  %vm1515_vm12 = vcmp.ge.f32.partialorder %v1503_v49, 0.0  ;;  %v1639_v42 = vld [vmem:[%s2372_s18] sm:$0xff] (%p2244_p12)  }
 0x41e   : > { %1640 = vst [vmem:[%s1622_s17] sm:$0xff] (%p2244_p12), %v1639_v42  }
 0x41f   : > { %v1605_v44 = vsel %vm589_vm3, %v1570_v43, %v1604_v30  ;;  %v1539_v58 = vsel %vm1515_vm12, %v1503_v49, %v1527_v52 }
 0x420   : > { %1898 = vst.msk [vmem:[%s2372_s18 + $0x10] sm:$0x7] %vm595_vm4, %v1605_v44  ;;  %v1572_v0 = vsel %vm526_vm1, %v1539_v58, 0.0 }
 0x421   : > { %v1573_v13 = vadd.f32 %v1572_v0, %v1571_v16 }
 0x423   : > { %v1574_v7 = vrot.slane %v1573_v13, 4 }
 0x425   : > { %v1575_v12 = vadd.f32 %v1574_v7, %v1573_v13 }
 0x427   : > { %v1576_v26 = vrot.slane %v1575_v12, 2 }
 0x42c   : > { %v1484_v53 = vpop.f32.mrf.mxu3 }
 0x42d   : > { %v1485_v48 = vadd.f32 %v2663_v55, %v1484_v53 }
 0x42f   : > { %v1504_v25 = vmul.f32 %v1485_v48, %v2540_v4 }
 0x431   : > { %v1528_v39 = vmul.f32 0.1, %v1504_v25  ;;  %vm1516_vm13 = vcmp.ge.f32.partialorder %v1504_v25, 0.0 }
 0x433   : > { %v1540_v33 = vsel %vm1516_vm13, %v1504_v25, %v1528_v39 }
 0x434   : > { %v1487_v51 = vpop.f32.mrf.mxu3  ;;  %v1580_v21 = vsel %vm526_vm1, %v1540_v33, 0.0 }
 0x435   : > { %v1488_v38 = vadd.f32 %v2663_v55, %v1487_v51 }
 0x437   : > { %v1505_v54 = vmul.f32 %v1488_v38, %v2542_v61 }
 0x439   : > { %vm1517_vm15 = vcmp.ge.f32.partialorder %v1505_v54, 0.0  ;;  %v1529_v57 = vmul.f32 0.1, %v1505_v54 }
 0x43b   : > { %v1541_v59 = vsel %vm1517_vm15, %v1505_v54, %v1529_v57 }
 0x43c   : > { %v1581_v62 = vsel %vm526_vm1, %v1541_v59, 0.0  ;;  %v1490_v31 = vpop.f32.mrf.mxu3 }
 0x43d   : > { %v1491_v2 = vadd.f32 %v2663_v55, %v1490_v31  ;;  %v1582_v60 = vadd.f32 %v1581_v62, %v1580_v21 }
 0x43f   : > { %v1506_v5 = vmul.f32 %v1491_v2, %v2540_v4  ;;  %v1583_v6 = vrot.slane %v1582_v60, 4 }
 0x441   : > { %v1530_v63 = vmul.f32 0.1, %v1506_v5  ;;  %v1584_v11 = vadd.f32 %v1583_v6, %v1582_v60  ;;  %vm1518_vm5 = vcmp.ge.f32.partialorder %v1506_v5, 0.0 }
 0x443   : > { %v1542_v14 = vsel %vm1518_vm5, %v1506_v5, %v1530_v63  ;;  %v1585_v23 = vrot.slane %v1584_v11, 2 }
 0x444   : > { %v1493_v9 = vpop.f32.mrf.mxu3  ;;  %v1589_v27 = vsel %vm526_vm1, %v1542_v14, 0.0 }
 0x445   : > { %v1494_v17 = vadd.f32 %v2663_v55, %v1493_v9  ;;  %v1586_v28 = vadd.f32 %v1585_v23, %v1584_v11  ;;  %v1577_v55 = vadd.f32 %v1576_v26, %v1575_v12 }
 0x447   : > { %v1507_v46 = vmul.f32 %v1494_v17, %v2542_v61  ;;  %v1587_v3 = vrot.slane %v1586_v28, 1  ;;  %v1578_v61 = vrot.slane %v1577_v55, 1 }
 0x449   : > { %vm1519_vm6 = vcmp.ge.f32.partialorder %v1507_v46, 0.0  ;;  %v1531_v18 = vmul.f32 0.1, %v1507_v46  ;;  %v1588_v36 = vadd.f32 %v1587_v3, %v1586_v28  ;;  %v1579_v40 = vadd.f32 %v1578_v61, %v1577_v55 }
 0x44b   : > { %v1543_v24 = vsel %vm1519_vm6, %v1507_v46, %v1531_v18  ;;  %v1606_v41 = vsel %vm587_vm2, %v1588_v36, %v1579_v40 }
 0x44c   : > { %v1590_v4 = vsel %vm526_vm1, %v1543_v24, 0.0 }
 0x44d   : > { %v1591_v1 = vadd.f32 %v1590_v4, %v1589_v27 }
 0x44f   : > { %v1592_v8 = vrot.slane %v1591_v1, 4 }
 0x451   : > { %v1593_v29 = vadd.f32 %v1592_v8, %v1591_v1 }
 0x453   : > { %v1594_v34 = vrot.slane %v1593_v29, 2 }
 0x455   : > { %v1595_v35 = vadd.f32 %v1594_v34, %v1593_v29 }
 0x457   : > { %v1596_v37 = vrot.slane %v1595_v35, 1 }
 0x458   : > { %1619 = sbr.rel (!%p2244_p12) target bundleno = 1125 (0x465), region = 68 }
 0x459   : > { %v1597_v10 = vadd.f32 %v1596_v37, %v1595_v35 }
 0x45b   : > { %v1607_v19 = vsel %vm589_vm3, %v1597_v10, %v1606_v41 }
 0x45c   : > { %1899 = vst.msk [vmem:[%s2372_s18 + $0x14] sm:$0x7] %vm595_vm4, %v1607_v19 }
 0x463   : > { %v1647_v43 = vld [vmem:[%s2372_s18 + $0x10] sm:$0xff]  }
 0x464   : > { %1648 = vst [vmem:[%s1622_s17 + $0x20] sm:$0xff] %v1647_v43  }
 0x465 PF: > { %s2746_s12 = smov %s2240_s27  ;;  %p19_p1 = scmp.ge.s32.totalorder %s2228_s24, 4  }
 0x466   : > { %s2747_s27 = smov %s2118_s28  ;;  %s2748_s28 = smov %s2122_s29 }
 0x467   : > { %s2749_s29 = smov %s2746_s12  ;;  %s2750_s30 = smov %s2228_s24 }
 0x468   :  { %21 = sbr.rel (!%p19_p1) target bundleno = 4 (0x4), region = 156 }
 0x46d   :  { %1696 = vsyncpa [#allocation3], 1 }
 0x46e   :  { %1698 = vsyncpa [#allocation3 + $0x1], 1 }
 0x46f   :  { %1699 = vsyncpa [#allocation5], 1 }

</bundles_post_ra>
